<compile_context>
chip_gen: v6e
topology: v6e:2x2x1
jax: 0.10.0
libtpu: 0.0.40
codegen_flags: <defaults>
</compile_context>

<pallas_src>
import functools
import math

import jax
import jax.numpy as jnp
import numpy as np
from jax import lax
from jax.experimental import pallas as pl
from jax.experimental.pallas import tpu as pltpu


# ----------------------------- Pallas kernel --------------------------------
def sent_level_kernel(sen_ref, w_ref, b_ref, out_ref, *, S, B, Din, Hs, C, row_off):
    f32 = jnp.float32
    D2 = 2 * Hs                 # bi-LSTM hidden width (fwd|bwd packed)
    G = 4 * D2                  # 4 gates x 2 directions
    SB = S * B
    inv_scale = 1.0 / math.sqrt(float(D2))

    # ---- static slices of the two coalesced parameter slabs (no extra DMAs) ----
    def wrow(name, nrows, ncols):
        r = row_off[name]
        return w_ref[r:r + nrows, 0:ncols]

    wx    = wrow("wx", Din, G)          # dense [per-gate: fwd|bwd] input projection
    whh   = wrow("whh", D2, G)          # block-scattered recurrent weights
    ff_w1 = wrow("ff_w1", D2, 4 * D2)
    ff_w2 = wrow("ff_w2", 4 * D2, D2)
    lin_w = wrow("lin_w", D2, D2)
    fc_w  = wrow("fc_w", 2 * D2, C)

    ln_g  = b_ref[0:1, 0:Din]
    ln_b  = b_ref[1:2, 0:Din]
    bx    = b_ref[2:3, 0:G]             # packed (b_ih + b_hh) for both directions
    lin_b = b_ref[3:4, 0:D2]
    ctx   = b_ref[4:5, 0:D2]
    ff_b1 = b_ref[5:6, 0:4 * D2]
    ff_b2 = b_ref[6:7, 0:D2]
    fc_b  = b_ref[7:8, 0:C]

    # ---- LayerNorm over the feature dim (eps = 1e-5, matching nn.LayerNorm) ----
    x = sen_ref[...].astype(f32)                          # (SB, Din), row t*B+b
    mean = jnp.mean(x, axis=-1, keepdims=True)
    var = jnp.mean(jnp.square(x - mean), axis=-1, keepdims=True)
    xn = (x - mean) * lax.rsqrt(var + 1e-5) * ln_g + ln_b

    # ---- hoisted dense input projection (one matmul) + biases -------------------
    gx = jnp.dot(xn, wx, preferred_element_type=f32) + bx   # (SB, G)

    # ---- interleaved bidirectional LSTM --------------------------------------
    # packed gate layout (i|f|o|g); each gate's 2Hs lanes = [fwd Hs | bwd Hs]
    gate_lane = lax.broadcasted_iota(jnp.int32, (B, G), 1)
    fwd_gate = (gate_lane % D2) < Hs                      # fwd half of every gate
    h_lane = lax.broadcasted_iota(jnp.int32, (B, D2), 1)
    fwd_half = h_lane < Hs

    h_cat = jnp.zeros((B, D2), f32)                       # [h_fwd | h_bwd]
    c_cat = jnp.zeros((B, D2), f32)
    h_steps = []
    for k in range(S):
        # fwd lanes take time k, bwd lanes take time S-1-k (single masked select)
        g_in = jnp.where(fwd_gate,
                         gx[k * B:(k + 1) * B, :],
                         gx[(S - 1 - k) * B:(S - k) * B, :])
        g = g_in + jnp.dot(h_cat, whh, preferred_element_type=f32)   # (B, G)
        s3 = jax.nn.sigmoid(g[:, 0:3 * D2])               # i|f|o in one EUP pass
        i_g = s3[:, 0:D2]
        f_g = s3[:, D2:2 * D2]
        o_g = s3[:, 2 * D2:3 * D2]
        g_g = jnp.tanh(g[:, 3 * D2:4 * D2])
        c_cat = f_g * c_cat + i_g * g_g
        h_cat = o_g * jnp.tanh(c_cat)
        h_steps.append(h_cat)    # lanes [0:Hs]: fwd@t=k, lanes [Hs:2Hs]: bwd@t=S-1-k

    # time-align the two halves with lane-masked selects; build (SB, D2) directly
    sh = jnp.concatenate(
        [jnp.where(fwd_half, h_steps[t], h_steps[S - 1 - t]) for t in range(S)],
        axis=0)                                           # (SB, D2), row t*B+b

    # ---- HAN attention: softmax over the sequence for each batch column -------
    u = jnp.tanh(jnp.dot(sh, lin_w, preferred_element_type=f32) + lin_b)   # (SB, D2)
    z = jnp.sum(u * ctx, axis=-1, keepdims=True) * inv_scale               # (SB, 1)
    m = jnp.max(z, axis=0, keepdims=True)                 # global shift (softmax-invariant)
    p = jnp.exp(z - m)
    # per-batch sequence sum via a 0/1 "same batch column" matmul (no reshapes)
    ri = lax.broadcasted_iota(jnp.int32, (SB, SB), 0)
    ci = lax.broadcasted_iota(jnp.int32, (SB, SB), 1)
    same_b = ((ri % B) == (ci % B)).astype(f32)           # (SB, SB)
    denom = jnp.dot(same_b, p, preferred_element_type=f32)
    att = p / denom                                       # exact softmax weights
    weighted = sh * att                                   # (SB, D2)

    # ---- PositionwiseFeedForward (dropout = identity at inference) -------------
    hmid = jnp.maximum(
        jnp.dot(weighted, ff_w1, preferred_element_type=f32) + ff_b1, 0.0)  # (SB, 4*D2)
    ffo = jnp.dot(hmid, ff_w2, preferred_element_type=f32) + ff_b2          # (SB, D2)

    # ---- concat(x, ff(x)), per-batch sum over sequence (0/1 matmul), fc_cat ----
    cat = jnp.concatenate([weighted, ffo], axis=-1)       # (SB, 2*D2)
    rb = lax.broadcasted_iota(jnp.int32, (B, SB), 0)
    cb = lax.broadcasted_iota(jnp.int32, (B, SB), 1)
    sel = ((cb % B) == rb).astype(f32)                    # (B, SB)
    summed = jnp.dot(sel, cat, preferred_element_type=f32)            # (B, 2*D2)
    out_ref[...] = jnp.dot(summed, fc_w, preferred_element_type=f32) + fc_b   # (B, C)


# --------------------- host-side parameter packing ---------------------------
_GATE_ORDER = (0, 1, 3, 2)   # PyTorch (i, f, g, o) -> packed (i, f, o, g)


def _pack_gates_dense(w_f, w_b, Hs):
    """Dense packed layout: for each packed gate, columns = [fwd gate | bwd gate]."""
    cols = []
    for src in _GATE_ORDER:
        cols.append(w_f[:, src * Hs:(src + 1) * Hs])
        cols.append(w_b[:, src * Hs:(src + 1) * Hs])
    return jnp.concatenate(cols, axis=1)                  # (rows, 8*Hs)


def _pack_whh(whh_f, whh_b, Hs):
    """Block-scattered recurrent weights: rows 0:Hs act on h_fwd -> fwd gate halves,
    rows Hs:2Hs act on h_bwd -> bwd gate halves."""
    z = jnp.zeros((Hs, Hs), jnp.float32)
    top, bot = [], []
    for src in _GATE_ORDER:
        top.extend([whh_f[:, src * Hs:(src + 1) * Hs], z])
        bot.extend([z, whh_b[:, src * Hs:(src + 1) * Hs]])
    return jnp.concatenate([jnp.concatenate(top, axis=1),
                            jnp.concatenate(bot, axis=1)], axis=0)   # (2Hs, 8Hs)


def _pad_to(a, rows=None, cols=None):
    r = a.shape[0] if rows is None else rows
    c = a.shape[1] if cols is None else cols
    return jnp.pad(a.astype(jnp.float32), ((0, r - a.shape[0]), (0, c - a.shape[1])))


# ------------------------------- wrapper -------------------------------------
def sent_level_rnn_forward(sen_vec, params):
    S, B, Din = sen_vec.shape
    Hs = params["whh_f"].shape[0]
    C = params["fc_w"].shape[1]
    D2 = 2 * Hs
    G = 4 * D2
    SB = S * B

    wx = _pack_gates_dense(params["wih_f"], params["wih_b"], Hs)    # (Din, G) dense
    bx = _pack_gates_dense(params["b_f"], params["b_b"], Hs)        # (1, G)
    whh = _pack_whh(params["whh_f"], params["whh_b"], Hs)           # (D2, G)

    W = max(Din, G, D2, 4 * D2, C)                                  # slab lane width

    # ---- weight slab: all matrices stacked row-wise, padded to W lanes ----
    named = [("wx", wx), ("whh", whh), ("ff_w1", params["ff_w1"]),
             ("ff_w2", params["ff_w2"]), ("lin_w", params["lin_w"]),
             ("fc_w", params["fc_w"])]
    row_off, parts, off = {}, [], 0
    for name, a in named:
        row_off[name] = off
        rpad = -(-a.shape[0] // 8) * 8          # keep sublane-aligned row offsets
        parts.append(_pad_to(a, rows=rpad, cols=W))
        off += rpad
    w_slab = jnp.concatenate(parts, axis=0)                         # (off, W)

    # ---- bias slab: one row per bias vector, padded to W lanes ----
    b_parts = [params["ln_g"], params["ln_b"], bx, params["lin_b"], params["ctx"],
               params["ff_b1"], params["ff_b2"], params["fc_b"]]
    b_slab = jnp.concatenate([_pad_to(a, cols=W) for a in b_parts], axis=0)   # (8, W)

    sen_flat = sen_vec.reshape(SB, Din)         # host-side reshape; kernel stays 2-D

    flops = 2 * (SB * Din * G            # input projection
                 + S * B * D2 * G        # recurrence
                 + SB * D2 * D2          # sentence_linear
                 + 2 * SB * D2 * 4 * D2  # FFN
                 + SB * SB               # softmax denominator matmul
                 + B * SB * 2 * D2       # per-batch sequence sum
                 + B * 2 * D2 * C)       # fc_cat
    transcendentals = S * B * 5 * D2 + SB * D2 + SB
    bytes_accessed = 4 * (sen_flat.size + w_slab.size + b_slab.size + B * C)
    cost = pl.CostEstimate(flops=int(flops), transcendentals=int(transcendentals),
                           bytes_accessed=int(bytes_accessed))

    kernel = functools.partial(sent_level_kernel, S=S, B=B, Din=Din, Hs=Hs, C=C,
                               row_off=row_off)

    # Single gridless invocation: everything resident in VMEM (~200 KiB), the kernel
    # is latency-bound, so a grid would only add per-step overhead.
    return pl.pallas_call(
        kernel,
        out_shape=jax.ShapeDtypeStruct((B, C), jnp.float32),
        in_specs=[pl.BlockSpec(memory_space=pltpu.MemorySpace.VMEM)] * 3,
        out_specs=pl.BlockSpec(memory_space=pltpu.MemorySpace.VMEM),
        cost_estimate=cost,
    )(sen_flat, w_slab, b_slab)


# -------------------------- pure-JAX reference --------------------------------
def reference_forward(sen_vec, p):
    f32 = jnp.float32
    S, B, Din = sen_vec.shape
    Hs = p["whh_f"].shape[0]
    D2 = 2 * Hs
    scale = math.sqrt(D2)

    x = sen_vec.astype(f32)
    mean = jnp.mean(x, axis=-1, keepdims=True)
    var = jnp.mean(jnp.square(x - mean), axis=-1, keepdims=True)
    xn = (x - mean) / jnp.sqrt(var + 1e-5) * p["ln_g"] + p["ln_b"]

    def cell(x_t, h, c, wih, whh, b):
        g = x_t @ wih + h @ whh + b
        i = jax.nn.sigmoid(g[:, 0:Hs]); f = jax.nn.sigmoid(g[:, Hs:2 * Hs])
        gg = jnp.tanh(g[:, 2 * Hs:3 * Hs]); o = jax.nn.sigmoid(g[:, 3 * Hs:4 * Hs])
        c = f * c + i * gg
        return o * jnp.tanh(c), c

    h = jnp.zeros((B, Hs), f32); c = jnp.zeros((B, Hs), f32)
    fwd = []
    for t in range(S):
        h, c = cell(xn[t], h, c, p["wih_f"], p["whh_f"], p["b_f"])
        fwd.append(h)
    h = jnp.zeros((B, Hs), f32); c = jnp.zeros((B, Hs), f32)
    bwd = [None] * S
    for t in range(S - 1, -1, -1):
        h, c = cell(xn[t], h, c, p["wih_b"], p["whh_b"], p["b_b"])
        bwd[t] = h
    sh = jnp.concatenate([jnp.stack(fwd, 0), jnp.stack(bwd, 0)], axis=-1)  # (S,B,2Hs)

    u = jnp.tanh(sh @ p["lin_w"] + p["lin_b"])
    z = jnp.sum(u * p["ctx"], axis=-1) / scale          # (S,B)
    att = jax.nn.softmax(z, axis=0)
    weighted = sh * att[:, :, None]

    hmid = jax.nn.relu(weighted @ p["ff_w1"] + p["ff_b1"])
    ffo = hmid @ p["ff_w2"] + p["ff_b2"]

    cat = jnp.concatenate([weighted, ffo], axis=-1)     # (S,B,4Hs)
    summed = jnp.sum(cat, axis=0)                       # (B,4Hs)
    return summed @ p["fc_w"] + p["fc_b"]


# --------------------------------- main ---------------------------------------
if __name__ == "__main__":
    # config: word_num_hidden = 16, sentence_num_hidden = 16, target_class = 4,
    #         dropout_rate = 0.1 (identity at eval), vae_struct = False
    S, B = 8, 2
    Hw, Hs, C = 16, 16, 4
    Din, D2 = 2 * Hw, 2 * Hs

    key = jax.random.PRNGKey(0)
    ks = jax.random.split(key, 16)

    def u(k, shape):
        return jax.random.uniform(k, shape, jnp.float32, -0.1, 0.1)

    params = {
        "ln_g": jnp.ones((1, Din), jnp.float32),
        "ln_b": jnp.zeros((1, Din), jnp.float32),
        "wih_f": u(ks[0], (Din, 4 * Hs)),
        "whh_f": u(ks[1], (Hs, 4 * Hs)),
        "b_f":   u(ks[2], (1, 4 * Hs)),          # b_ih + b_hh folded together
        "wih_b": u(ks[3], (Din, 4 * Hs)),
        "whh_b": u(ks[4], (Hs, 4 * Hs)),
        "b_b":   u(ks[5], (1, 4 * Hs)),
        "lin_w": u(ks[6], (D2, D2)),
        "lin_b": u(ks[7], (1, D2)),
        "ctx":   u(ks[8], (1, D2)),
        "ff_w1": u(ks[9], (D2, 4 * D2)),
        "ff_b1": u(ks[10], (1, 4 * D2)),
        "ff_w2": u(ks[11], (4 * D2, D2)),
        "ff_b2": u(ks[12], (1, D2)),
        "fc_w":  u(ks[13], (2 * D2, C)),
        "fc_b":  u(ks[14], (1, C)),
    }

    sen_vec = jax.random.normal(ks[15], (S, B, Din), jnp.float32)

    out = sent_level_rnn_forward(sen_vec, params)
    out = jax.block_until_ready(out)

    ref = jax.block_until_ready(reference_forward(sen_vec, params))
    np.testing.assert_allclose(np.asarray(out), np.asarray(ref), rtol=2e-2, atol=2e-3)

    print("KERNEL_OK")
</pallas_src>

<mosaic_0001>
module attributes {stable_mosaic.version = 11 : i64} {
  func.func @sent_level_kernel(%arg0: memref<16x32xf32, #tpu.memory_space<vmem>>, %arg1: memref<320x128xf32, #tpu.memory_space<vmem>>, %arg2: memref<8x128xf32, #tpu.memory_space<vmem>>, %arg3: memref<2x4xf32, #tpu.memory_space<vmem>>) attributes {dimension_semantics = [], scalar_prefetch = 0 : i64, scratch_operands = 0 : i64, tpu.core_type = #tpu.core_type<tc>} {
    %c0 = arith.constant 0 : index
    %c0_0 = arith.constant 0 : index
    %0 = vector.load %arg1[%c0, %c0_0] : memref<320x128xf32, #tpu.memory_space<vmem>>, vector<32x128xf32>
    %c32 = arith.constant 32 : index
    %c0_1 = arith.constant 0 : index
    %1 = vector.load %arg1[%c32, %c0_1] : memref<320x128xf32, #tpu.memory_space<vmem>>, vector<32x128xf32>
    %c64 = arith.constant 64 : index
    %c0_2 = arith.constant 0 : index
    %2 = vector.load %arg1[%c64, %c0_2] : memref<320x128xf32, #tpu.memory_space<vmem>>, vector<32x128xf32>
    %c96 = arith.constant 96 : index
    %c0_3 = arith.constant 0 : index
    %3 = vector.load %arg1[%c96, %c0_3] : memref<320x128xf32, #tpu.memory_space<vmem>>, vector<128x32xf32>
    %c224 = arith.constant 224 : index
    %c0_4 = arith.constant 0 : index
    %4 = vector.load %arg1[%c224, %c0_4] : memref<320x128xf32, #tpu.memory_space<vmem>>, vector<32x32xf32>
    %c256 = arith.constant 256 : index
    %c0_5 = arith.constant 0 : index
    %5 = vector.load %arg1[%c256, %c0_5] : memref<320x128xf32, #tpu.memory_space<vmem>>, vector<64x4xf32>
    %c0_6 = arith.constant 0 : index
    %c0_7 = arith.constant 0 : index
    %6 = vector.load %arg2[%c0_6, %c0_7] : memref<8x128xf32, #tpu.memory_space<vmem>>, vector<1x32xf32>
    %c1 = arith.constant 1 : index
    %c0_8 = arith.constant 0 : index
    %7 = vector.load %arg2[%c1, %c0_8] : memref<8x128xf32, #tpu.memory_space<vmem>>, vector<1x32xf32>
    %c2 = arith.constant 2 : index
    %c0_9 = arith.constant 0 : index
    %8 = vector.load %arg2[%c2, %c0_9] : memref<8x128xf32, #tpu.memory_space<vmem>>, vector<1x128xf32>
    %c3 = arith.constant 3 : index
    %c0_10 = arith.constant 0 : index
    %9 = vector.load %arg2[%c3, %c0_10] : memref<8x128xf32, #tpu.memory_space<vmem>>, vector<1x32xf32>
    %c4 = arith.constant 4 : index
    %c0_11 = arith.constant 0 : index
    %10 = vector.load %arg2[%c4, %c0_11] : memref<8x128xf32, #tpu.memory_space<vmem>>, vector<1x32xf32>
    %c5 = arith.constant 5 : index
    %c0_12 = arith.constant 0 : index
    %11 = vector.load %arg2[%c5, %c0_12] : memref<8x128xf32, #tpu.memory_space<vmem>>, vector<1x128xf32>
    %c6 = arith.constant 6 : index
    %c0_13 = arith.constant 0 : index
    %12 = vector.load %arg2[%c6, %c0_13] : memref<8x128xf32, #tpu.memory_space<vmem>>, vector<1x32xf32>
    %c7 = arith.constant 7 : index
    %c0_14 = arith.constant 0 : index
    %13 = vector.load %arg2[%c7, %c0_14] : memref<8x128xf32, #tpu.memory_space<vmem>>, vector<1x4xf32>
    %c0_15 = arith.constant 0 : index
    %c0_16 = arith.constant 0 : index
    %14 = vector.load %arg0[%c0_15, %c0_16] : memref<16x32xf32, #tpu.memory_space<vmem>>, vector<16x32xf32>
    %cst = arith.constant dense<0.000000e+00> : vector<16xf32>
    %15 = vector.multi_reduction <add>, %14, %cst [1] : vector<16x32xf32> to vector<16xf32>
    %16 = vector.shape_cast %15 : vector<16xf32> to vector<16x1xf32>
    %cst_17 = arith.constant 3.200000e+01 : f32
    %17 = vector.broadcast %cst_17 : f32 to vector<16x1xf32>
    %18 = arith.divf %16, %17 : vector<16x1xf32>
    %19 = vector.broadcast %18 : vector<16x1xf32> to vector<16x32xf32>
    %20 = arith.subf %14, %19 : vector<16x32xf32>
    %21 = arith.mulf %20, %20 : vector<16x32xf32>
    %cst_18 = arith.constant dense<0.000000e+00> : vector<16xf32>
    %22 = vector.multi_reduction <add>, %21, %cst_18 [1] : vector<16x32xf32> to vector<16xf32>
    %23 = vector.shape_cast %22 : vector<16xf32> to vector<16x1xf32>
    %cst_19 = arith.constant 3.200000e+01 : f32
    %24 = vector.broadcast %cst_19 : f32 to vector<16x1xf32>
    %25 = arith.divf %23, %24 : vector<16x1xf32>
    %26 = vector.broadcast %18 : vector<16x1xf32> to vector<16x32xf32>
    %27 = arith.subf %14, %26 : vector<16x32xf32>
    %cst_20 = arith.constant 9.99999974E-6 : f32
    %28 = vector.broadcast %cst_20 : f32 to vector<16x1xf32>
    %29 = arith.addf %25, %28 : vector<16x1xf32>
    %30 = math.rsqrt %29 : vector<16x1xf32>
    %31 = vector.broadcast %30 : vector<16x1xf32> to vector<16x32xf32>
    %32 = arith.mulf %27, %31 : vector<16x32xf32>
    %33 = vector.broadcast %6 : vector<1x32xf32> to vector<16x32xf32>
    %34 = arith.mulf %32, %33 : vector<16x32xf32>
    %35 = vector.broadcast %7 : vector<1x32xf32> to vector<16x32xf32>
    %36 = arith.addf %34, %35 : vector<16x32xf32>
    %cst_21 = arith.constant dense<0.000000e+00> : vector<16x128xf32>
    %37 = tpu.matmul %36, %0, %cst_21 {dimension_numbers = #tpu.dot_dimension_numbers<[1], [0], [0], [1], [0, 0, 1, 1], [], []>} : vector<16x32xf32>, vector<32x128xf32>, vector<16x128xf32> -> vector<16x128xf32>
    %38 = vector.broadcast %8 : vector<1x128xf32> to vector<16x128xf32>
    %39 = arith.addf %37, %38 : vector<16x128xf32>
    %40 = tpu.iota {dimensions = array<i32: 1>} : vector<2x128xi32>
    %c32_i32 = arith.constant 32 : i32
    %c0_i32 = arith.constant 0 : i32
    %41 = arith.cmpi eq, %c32_i32, %c0_i32 : i32
    %c1_i32 = arith.constant 1 : i32
    %42 = arith.select %41, %c1_i32, %c32_i32 : i32
    %43 = vector.broadcast %42 : i32 to vector<2x128xi32>
    %44 = arith.remsi %40, %43 : vector<2x128xi32>
    %c0_i32_22 = arith.constant 0 : i32
    %45 = vector.broadcast %c0_i32_22 : i32 to vector<2x128xi32>
    %46 = arith.cmpi ne, %44, %45 : vector<2x128xi32>
    %c0_i32_23 = arith.constant 0 : i32
    %47 = vector.broadcast %c0_i32_23 : i32 to vector<2x128xi32>
    %48 = arith.cmpi slt, %44, %47 : vector<2x128xi32>
    %c0_i32_24 = arith.constant 0 : i32
    %49 = arith.cmpi slt, %42, %c0_i32_24 : i32
    %50 = vector.broadcast %49 : i1 to vector<2x128xi1>
    %51 = vector.broadcast %50 : vector<2x128xi1> to vector<2x128xi1>
    %52 = arith.xori %48, %51 : vector<2x128xi1>
    %53 = arith.andi %52, %46 : vector<2x128xi1>
    %54 = vector.broadcast %42 : i32 to vector<2x128xi32>
    %55 = arith.addi %44, %54 : vector<2x128xi32>
    %56 = arith.select %53, %55, %44 : vector<2x128xi1>, vector<2x128xi32>
    %c16_i32 = arith.constant 16 : i32
    %57 = vector.broadcast %c16_i32 : i32 to vector<2x128xi32>
    %58 = arith.cmpi slt, %56, %57 : vector<2x128xi32>
    %59 = tpu.iota {dimensions = array<i32: 1>} : vector<2x32xi32>
    %c16_i32_25 = arith.constant 16 : i32
    %60 = vector.broadcast %c16_i32_25 : i32 to vector<2x32xi32>
    %61 = arith.cmpi slt, %59, %60 : vector<2x32xi32>
    %cst_26 = arith.constant 0.000000e+00 : f32
    %62 = vector.broadcast %cst_26 : f32 to vector<2x32xf32>
    %cst_27 = arith.constant 0.000000e+00 : f32
    %63 = vector.broadcast %cst_27 : f32 to vector<2x32xf32>
    %64 = vector.extract_strided_slice %39 {offsets = [0, 0], sizes = [2, 128], strides = [1, 1]} : vector<16x128xf32> to vector<2x128xf32>
    %65 = vector.extract_strided_slice %39 {offsets = [14, 0], sizes = [2, 128], strides = [1, 1]} : vector<16x128xf32> to vector<2x128xf32>
    %66 = arith.select %58, %64, %65 : vector<2x128xi1>, vector<2x128xf32>
    %cst_28 = arith.constant dense<0.000000e+00> : vector<2x128xf32>
    %67 = tpu.matmul %62, %1, %cst_28 {dimension_numbers = #tpu.dot_dimension_numbers<[1], [0], [0], [1], [0, 0, 1, 1], [], []>} : vector<2x32xf32>, vector<32x128xf32>, vector<2x128xf32> -> vector<2x128xf32>
    %68 = arith.addf %66, %67 : vector<2x128xf32>
    %69 = vector.extract_strided_slice %68 {offsets = [0, 0], sizes = [2, 96], strides = [1, 1]} : vector<2x128xf32> to vector<2x96xf32>
    %70 = arith.negf %69 : vector<2x96xf32>
    %71 = math.exp %70 : vector<2x96xf32>
    %cst_29 = arith.constant 1.000000e+00 : f32
    %72 = vector.broadcast %cst_29 : f32 to vector<2x96xf32>
    %73 = arith.addf %72, %71 : vector<2x96xf32>
    %74 = arith.divf %72, %73 : vector<2x96xf32>
    %75 = vector.extract_strided_slice %74 {offsets = [0, 0], sizes = [2, 32], strides = [1, 1]} : vector<2x96xf32> to vector<2x32xf32>
    %76 = vector.extract_strided_slice %74 {offsets = [0, 32], sizes = [2, 32], strides = [1, 1]} : vector<2x96xf32> to vector<2x32xf32>
    %77 = vector.extract_strided_slice %74 {offsets = [0, 64], sizes = [2, 32], strides = [1, 1]} : vector<2x96xf32> to vector<2x32xf32>
    %78 = vector.extract_strided_slice %68 {offsets = [0, 96], sizes = [2, 32], strides = [1, 1]} : vector<2x128xf32> to vector<2x32xf32>
    %79 = math.tanh %78 : vector<2x32xf32>
    %80 = arith.mulf %76, %63 : vector<2x32xf32>
    %81 = arith.mulf %75, %79 : vector<2x32xf32>
    %82 = arith.addf %80, %81 : vector<2x32xf32>
    %83 = math.tanh %82 : vector<2x32xf32>
    %84 = arith.mulf %77, %83 : vector<2x32xf32>
    %85 = vector.extract_strided_slice %39 {offsets = [2, 0], sizes = [2, 128], strides = [1, 1]} : vector<16x128xf32> to vector<2x128xf32>
    %86 = vector.extract_strided_slice %39 {offsets = [12, 0], sizes = [2, 128], strides = [1, 1]} : vector<16x128xf32> to vector<2x128xf32>
    %87 = arith.select %58, %85, %86 : vector<2x128xi1>, vector<2x128xf32>
    %cst_30 = arith.constant dense<0.000000e+00> : vector<2x128xf32>
    %88 = tpu.matmul %84, %1, %cst_30 {dimension_numbers = #tpu.dot_dimension_numbers<[1], [0], [0], [1], [0, 0, 1, 1], [], []>} : vector<2x32xf32>, vector<32x128xf32>, vector<2x128xf32> -> vector<2x128xf32>
    %89 = arith.addf %87, %88 : vector<2x128xf32>
    %90 = vector.extract_strided_slice %89 {offsets = [0, 0], sizes = [2, 96], strides = [1, 1]} : vector<2x128xf32> to vector<2x96xf32>
    %91 = arith.negf %90 : vector<2x96xf32>
    %92 = math.exp %91 : vector<2x96xf32>
    %cst_31 = arith.constant 1.000000e+00 : f32
    %93 = vector.broadcast %cst_31 : f32 to vector<2x96xf32>
    %94 = arith.addf %93, %92 : vector<2x96xf32>
    %95 = arith.divf %93, %94 : vector<2x96xf32>
    %96 = vector.extract_strided_slice %95 {offsets = [0, 0], sizes = [2, 32], strides = [1, 1]} : vector<2x96xf32> to vector<2x32xf32>
    %97 = vector.extract_strided_slice %95 {offsets = [0, 32], sizes = [2, 32], strides = [1, 1]} : vector<2x96xf32> to vector<2x32xf32>
    %98 = vector.extract_strided_slice %95 {offsets = [0, 64], sizes = [2, 32], strides = [1, 1]} : vector<2x96xf32> to vector<2x32xf32>
    %99 = vector.extract_strided_slice %89 {offsets = [0, 96], sizes = [2, 32], strides = [1, 1]} : vector<2x128xf32> to vector<2x32xf32>
    %100 = math.tanh %99 : vector<2x32xf32>
    %101 = arith.mulf %97, %82 : vector<2x32xf32>
    %102 = arith.mulf %96, %100 : vector<2x32xf32>
    %103 = arith.addf %101, %102 : vector<2x32xf32>
    %104 = math.tanh %103 : vector<2x32xf32>
    %105 = arith.mulf %98, %104 : vector<2x32xf32>
    %106 = vector.extract_strided_slice %39 {offsets = [4, 0], sizes = [2, 128], strides = [1, 1]} : vector<16x128xf32> to vector<2x128xf32>
    %107 = vector.extract_strided_slice %39 {offsets = [10, 0], sizes = [2, 128], strides = [1, 1]} : vector<16x128xf32> to vector<2x128xf32>
    %108 = arith.select %58, %106, %107 : vector<2x128xi1>, vector<2x128xf32>
    %cst_32 = arith.constant dense<0.000000e+00> : vector<2x128xf32>
    %109 = tpu.matmul %105, %1, %cst_32 {dimension_numbers = #tpu.dot_dimension_numbers<[1], [0], [0], [1], [0, 0, 1, 1], [], []>} : vector<2x32xf32>, vector<32x128xf32>, vector<2x128xf32> -> vector<2x128xf32>
    %110 = arith.addf %108, %109 : vector<2x128xf32>
    %111 = vector.extract_strided_slice %110 {offsets = [0, 0], sizes = [2, 96], strides = [1, 1]} : vector<2x128xf32> to vector<2x96xf32>
    %112 = arith.negf %111 : vector<2x96xf32>
    %113 = math.exp %112 : vector<2x96xf32>
    %cst_33 = arith.constant 1.000000e+00 : f32
    %114 = vector.broadcast %cst_33 : f32 to vector<2x96xf32>
    %115 = arith.addf %114, %113 : vector<2x96xf32>
    %116 = arith.divf %114, %115 : vector<2x96xf32>
    %117 = vector.extract_strided_slice %116 {offsets = [0, 0], sizes = [2, 32], strides = [1, 1]} : vector<2x96xf32> to vector<2x32xf32>
    %118 = vector.extract_strided_slice %116 {offsets = [0, 32], sizes = [2, 32], strides = [1, 1]} : vector<2x96xf32> to vector<2x32xf32>
    %119 = vector.extract_strided_slice %116 {offsets = [0, 64], sizes = [2, 32], strides = [1, 1]} : vector<2x96xf32> to vector<2x32xf32>
    %120 = vector.extract_strided_slice %110 {offsets = [0, 96], sizes = [2, 32], strides = [1, 1]} : vector<2x128xf32> to vector<2x32xf32>
    %121 = math.tanh %120 : vector<2x32xf32>
    %122 = arith.mulf %118, %103 : vector<2x32xf32>
    %123 = arith.mulf %117, %121 : vector<2x32xf32>
    %124 = arith.addf %122, %123 : vector<2x32xf32>
    %125 = math.tanh %124 : vector<2x32xf32>
    %126 = arith.mulf %119, %125 : vector<2x32xf32>
    %127 = vector.extract_strided_slice %39 {offsets = [6, 0], sizes = [2, 128], strides = [1, 1]} : vector<16x128xf32> to vector<2x128xf32>
    %128 = vector.extract_strided_slice %39 {offsets = [8, 0], sizes = [2, 128], strides = [1, 1]} : vector<16x128xf32> to vector<2x128xf32>
    %129 = arith.select %58, %127, %128 : vector<2x128xi1>, vector<2x128xf32>
    %cst_34 = arith.constant dense<0.000000e+00> : vector<2x128xf32>
    %130 = tpu.matmul %126, %1, %cst_34 {dimension_numbers = #tpu.dot_dimension_numbers<[1], [0], [0], [1], [0, 0, 1, 1], [], []>} : vector<2x32xf32>, vector<32x128xf32>, vector<2x128xf32> -> vector<2x128xf32>
    %131 = arith.addf %129, %130 : vector<2x128xf32>
    %132 = vector.extract_strided_slice %131 {offsets = [0, 0], sizes = [2, 96], strides = [1, 1]} : vector<2x128xf32> to vector<2x96xf32>
    %133 = arith.negf %132 : vector<2x96xf32>
    %134 = math.exp %133 : vector<2x96xf32>
    %cst_35 = arith.constant 1.000000e+00 : f32
    %135 = vector.broadcast %cst_35 : f32 to vector<2x96xf32>
    %136 = arith.addf %135, %134 : vector<2x96xf32>
    %137 = arith.divf %135, %136 : vector<2x96xf32>
    %138 = vector.extract_strided_slice %137 {offsets = [0, 0], sizes = [2, 32], strides = [1, 1]} : vector<2x96xf32> to vector<2x32xf32>
    %139 = vector.extract_strided_slice %137 {offsets = [0, 32], sizes = [2, 32], strides = [1, 1]} : vector<2x96xf32> to vector<2x32xf32>
    %140 = vector.extract_strided_slice %137 {offsets = [0, 64], sizes = [2, 32], strides = [1, 1]} : vector<2x96xf32> to vector<2x32xf32>
    %141 = vector.extract_strided_slice %131 {offsets = [0, 96], sizes = [2, 32], strides = [1, 1]} : vector<2x128xf32> to vector<2x32xf32>
    %142 = math.tanh %141 : vector<2x32xf32>
    %143 = arith.mulf %139, %124 : vector<2x32xf32>
    %144 = arith.mulf %138, %142 : vector<2x32xf32>
    %145 = arith.addf %143, %144 : vector<2x32xf32>
    %146 = math.tanh %145 : vector<2x32xf32>
    %147 = arith.mulf %140, %146 : vector<2x32xf32>
    %148 = vector.extract_strided_slice %39 {offsets = [8, 0], sizes = [2, 128], strides = [1, 1]} : vector<16x128xf32> to vector<2x128xf32>
    %149 = vector.extract_strided_slice %39 {offsets = [6, 0], sizes = [2, 128], strides = [1, 1]} : vector<16x128xf32> to vector<2x128xf32>
    %150 = arith.select %58, %148, %149 : vector<2x128xi1>, vector<2x128xf32>
    %cst_36 = arith.constant dense<0.000000e+00> : vector<2x128xf32>
    %151 = tpu.matmul %147, %1, %cst_36 {dimension_numbers = #tpu.dot_dimension_numbers<[1], [0], [0], [1], [0, 0, 1, 1], [], []>} : vector<2x32xf32>, vector<32x128xf32>, vector<2x128xf32> -> vector<2x128xf32>
    %152 = arith.addf %150, %151 : vector<2x128xf32>
    %153 = vector.extract_strided_slice %152 {offsets = [0, 0], sizes = [2, 96], strides = [1, 1]} : vector<2x128xf32> to vector<2x96xf32>
    %154 = arith.negf %153 : vector<2x96xf32>
    %155 = math.exp %154 : vector<2x96xf32>
    %cst_37 = arith.constant 1.000000e+00 : f32
    %156 = vector.broadcast %cst_37 : f32 to vector<2x96xf32>
    %157 = arith.addf %156, %155 : vector<2x96xf32>
    %158 = arith.divf %156, %157 : vector<2x96xf32>
    %159 = vector.extract_strided_slice %158 {offsets = [0, 0], sizes = [2, 32], strides = [1, 1]} : vector<2x96xf32> to vector<2x32xf32>
    %160 = vector.extract_strided_slice %158 {offsets = [0, 32], sizes = [2, 32], strides = [1, 1]} : vector<2x96xf32> to vector<2x32xf32>
    %161 = vector.extract_strided_slice %158 {offsets = [0, 64], sizes = [2, 32], strides = [1, 1]} : vector<2x96xf32> to vector<2x32xf32>
    %162 = vector.extract_strided_slice %152 {offsets = [0, 96], sizes = [2, 32], strides = [1, 1]} : vector<2x128xf32> to vector<2x32xf32>
    %163 = math.tanh %162 : vector<2x32xf32>
    %164 = arith.mulf %160, %145 : vector<2x32xf32>
    %165 = arith.mulf %159, %163 : vector<2x32xf32>
    %166 = arith.addf %164, %165 : vector<2x32xf32>
    %167 = math.tanh %166 : vector<2x32xf32>
    %168 = arith.mulf %161, %167 : vector<2x32xf32>
    %169 = vector.extract_strided_slice %39 {offsets = [10, 0], sizes = [2, 128], strides = [1, 1]} : vector<16x128xf32> to vector<2x128xf32>
    %170 = vector.extract_strided_slice %39 {offsets = [4, 0], sizes = [2, 128], strides = [1, 1]} : vector<16x128xf32> to vector<2x128xf32>
    %171 = arith.select %58, %169, %170 : vector<2x128xi1>, vector<2x128xf32>
    %cst_38 = arith.constant dense<0.000000e+00> : vector<2x128xf32>
    %172 = tpu.matmul %168, %1, %cst_38 {dimension_numbers = #tpu.dot_dimension_numbers<[1], [0], [0], [1], [0, 0, 1, 1], [], []>} : vector<2x32xf32>, vector<32x128xf32>, vector<2x128xf32> -> vector<2x128xf32>
    %173 = arith.addf %171, %172 : vector<2x128xf32>
    %174 = vector.extract_strided_slice %173 {offsets = [0, 0], sizes = [2, 96], strides = [1, 1]} : vector<2x128xf32> to vector<2x96xf32>
    %175 = arith.negf %174 : vector<2x96xf32>
    %176 = math.exp %175 : vector<2x96xf32>
    %cst_39 = arith.constant 1.000000e+00 : f32
    %177 = vector.broadcast %cst_39 : f32 to vector<2x96xf32>
    %178 = arith.addf %177, %176 : vector<2x96xf32>
    %179 = arith.divf %177, %178 : vector<2x96xf32>
    %180 = vector.extract_strided_slice %179 {offsets = [0, 0], sizes = [2, 32], strides = [1, 1]} : vector<2x96xf32> to vector<2x32xf32>
    %181 = vector.extract_strided_slice %179 {offsets = [0, 32], sizes = [2, 32], strides = [1, 1]} : vector<2x96xf32> to vector<2x32xf32>
    %182 = vector.extract_strided_slice %179 {offsets = [0, 64], sizes = [2, 32], strides = [1, 1]} : vector<2x96xf32> to vector<2x32xf32>
    %183 = vector.extract_strided_slice %173 {offsets = [0, 96], sizes = [2, 32], strides = [1, 1]} : vector<2x128xf32> to vector<2x32xf32>
    %184 = math.tanh %183 : vector<2x32xf32>
    %185 = arith.mulf %181, %166 : vector<2x32xf32>
    %186 = arith.mulf %180, %184 : vector<2x32xf32>
    %187 = arith.addf %185, %186 : vector<2x32xf32>
    %188 = math.tanh %187 : vector<2x32xf32>
    %189 = arith.mulf %182, %188 : vector<2x32xf32>
    %190 = vector.extract_strided_slice %39 {offsets = [12, 0], sizes = [2, 128], strides = [1, 1]} : vector<16x128xf32> to vector<2x128xf32>
    %191 = vector.extract_strided_slice %39 {offsets = [2, 0], sizes = [2, 128], strides = [1, 1]} : vector<16x128xf32> to vector<2x128xf32>
    %192 = arith.select %58, %190, %191 : vector<2x128xi1>, vector<2x128xf32>
    %cst_40 = arith.constant dense<0.000000e+00> : vector<2x128xf32>
    %193 = tpu.matmul %189, %1, %cst_40 {dimension_numbers = #tpu.dot_dimension_numbers<[1], [0], [0], [1], [0, 0, 1, 1], [], []>} : vector<2x32xf32>, vector<32x128xf32>, vector<2x128xf32> -> vector<2x128xf32>
    %194 = arith.addf %192, %193 : vector<2x128xf32>
    %195 = vector.extract_strided_slice %194 {offsets = [0, 0], sizes = [2, 96], strides = [1, 1]} : vector<2x128xf32> to vector<2x96xf32>
    %196 = arith.negf %195 : vector<2x96xf32>
    %197 = math.exp %196 : vector<2x96xf32>
    %cst_41 = arith.constant 1.000000e+00 : f32
    %198 = vector.broadcast %cst_41 : f32 to vector<2x96xf32>
    %199 = arith.addf %198, %197 : vector<2x96xf32>
    %200 = arith.divf %198, %199 : vector<2x96xf32>
    %201 = vector.extract_strided_slice %200 {offsets = [0, 0], sizes = [2, 32], strides = [1, 1]} : vector<2x96xf32> to vector<2x32xf32>
    %202 = vector.extract_strided_slice %200 {offsets = [0, 32], sizes = [2, 32], strides = [1, 1]} : vector<2x96xf32> to vector<2x32xf32>
    %203 = vector.extract_strided_slice %200 {offsets = [0, 64], sizes = [2, 32], strides = [1, 1]} : vector<2x96xf32> to vector<2x32xf32>
    %204 = vector.extract_strided_slice %194 {offsets = [0, 96], sizes = [2, 32], strides = [1, 1]} : vector<2x128xf32> to vector<2x32xf32>
    %205 = math.tanh %204 : vector<2x32xf32>
    %206 = arith.mulf %202, %187 : vector<2x32xf32>
    %207 = arith.mulf %201, %205 : vector<2x32xf32>
    %208 = arith.addf %206, %207 : vector<2x32xf32>
    %209 = math.tanh %208 : vector<2x32xf32>
    %210 = arith.mulf %203, %209 : vector<2x32xf32>
    %211 = vector.extract_strided_slice %39 {offsets = [14, 0], sizes = [2, 128], strides = [1, 1]} : vector<16x128xf32> to vector<2x128xf32>
    %212 = vector.extract_strided_slice %39 {offsets = [0, 0], sizes = [2, 128], strides = [1, 1]} : vector<16x128xf32> to vector<2x128xf32>
    %213 = arith.select %58, %211, %212 : vector<2x128xi1>, vector<2x128xf32>
    %cst_42 = arith.constant dense<0.000000e+00> : vector<2x128xf32>
    %214 = tpu.matmul %210, %1, %cst_42 {dimension_numbers = #tpu.dot_dimension_numbers<[1], [0], [0], [1], [0, 0, 1, 1], [], []>} : vector<2x32xf32>, vector<32x128xf32>, vector<2x128xf32> -> vector<2x128xf32>
    %215 = arith.addf %213, %214 : vector<2x128xf32>
    %216 = vector.extract_strided_slice %215 {offsets = [0, 0], sizes = [2, 96], strides = [1, 1]} : vector<2x128xf32> to vector<2x96xf32>
    %217 = arith.negf %216 : vector<2x96xf32>
    %218 = math.exp %217 : vector<2x96xf32>
    %cst_43 = arith.constant 1.000000e+00 : f32
    %219 = vector.broadcast %cst_43 : f32 to vector<2x96xf32>
    %220 = arith.addf %219, %218 : vector<2x96xf32>
    %221 = arith.divf %219, %220 : vector<2x96xf32>
    %222 = vector.extract_strided_slice %221 {offsets = [0, 0], sizes = [2, 32], strides = [1, 1]} : vector<2x96xf32> to vector<2x32xf32>
    %223 = vector.extract_strided_slice %221 {offsets = [0, 32], sizes = [2, 32], strides = [1, 1]} : vector<2x96xf32> to vector<2x32xf32>
    %224 = vector.extract_strided_slice %221 {offsets = [0, 64], sizes = [2, 32], strides = [1, 1]} : vector<2x96xf32> to vector<2x32xf32>
    %225 = vector.extract_strided_slice %215 {offsets = [0, 96], sizes = [2, 32], strides = [1, 1]} : vector<2x128xf32> to vector<2x32xf32>
    %226 = math.tanh %225 : vector<2x32xf32>
    %227 = arith.mulf %223, %208 : vector<2x32xf32>
    %228 = arith.mulf %222, %226 : vector<2x32xf32>
    %229 = arith.addf %227, %228 : vector<2x32xf32>
    %230 = math.tanh %229 : vector<2x32xf32>
    %231 = arith.mulf %224, %230 : vector<2x32xf32>
    %232 = arith.select %61, %84, %231 : vector<2x32xi1>, vector<2x32xf32>
    %233 = arith.select %61, %105, %210 : vector<2x32xi1>, vector<2x32xf32>
    %234 = arith.select %61, %126, %189 : vector<2x32xi1>, vector<2x32xf32>
    %235 = arith.select %61, %147, %168 : vector<2x32xi1>, vector<2x32xf32>
    %236 = arith.select %61, %168, %147 : vector<2x32xi1>, vector<2x32xf32>
    %237 = arith.select %61, %189, %126 : vector<2x32xi1>, vector<2x32xf32>
    %238 = arith.select %61, %210, %105 : vector<2x32xi1>, vector<2x32xf32>
    %239 = arith.select %61, %231, %84 : vector<2x32xi1>, vector<2x32xf32>
    %240 = tpu.concatenate %232, %233, %234, %235, %236, %237, %238, %239 in 0 : vector<2x32xf32>, vector<2x32xf32>, vector<2x32xf32>, vector<2x32xf32>, vector<2x32xf32>, vector<2x32xf32>, vector<2x32xf32>, vector<2x32xf32> -> vector<16x32xf32>
    %cst_44 = arith.constant dense<0.000000e+00> : vector<16x32xf32>
    %241 = tpu.matmul %240, %4, %cst_44 {dimension_numbers = #tpu.dot_dimension_numbers<[1], [0], [0], [1], [0, 0, 1, 1], [], []>} : vector<16x32xf32>, vector<32x32xf32>, vector<16x32xf32> -> vector<16x32xf32>
    %242 = vector.broadcast %9 : vector<1x32xf32> to vector<16x32xf32>
    %243 = arith.addf %241, %242 : vector<16x32xf32>
    %244 = math.tanh %243 : vector<16x32xf32>
    %245 = vector.broadcast %10 : vector<1x32xf32> to vector<16x32xf32>
    %246 = arith.mulf %244, %245 : vector<16x32xf32>
    %cst_45 = arith.constant dense<0.000000e+00> : vector<16xf32>
    %247 = vector.multi_reduction <add>, %246, %cst_45 [1] : vector<16x32xf32> to vector<16xf32>
    %248 = vector.shape_cast %247 : vector<16xf32> to vector<16x1xf32>
    %cst_46 = arith.constant 0.176776692 : f32
    %249 = vector.broadcast %cst_46 : f32 to vector<16x1xf32>
    %250 = arith.mulf %248, %249 : vector<16x1xf32>
    %cst_47 = arith.constant dense<0xFF800000> : vector<1xf32>
    %251 = vector.multi_reduction <maximumf>, %250, %cst_47 [0] : vector<16x1xf32> to vector<1xf32>
    %252 = vector.shape_cast %251 : vector<1xf32> to vector<1x1xf32>
    %253 = vector.broadcast %252 : vector<1x1xf32> to vector<16x1xf32>
    %254 = arith.subf %250, %253 : vector<16x1xf32>
    %255 = math.exp %254 : vector<16x1xf32>
    %256 = tpu.iota {dimensions = array<i32: 0>} : vector<16x16xi32>
    %257 = tpu.iota {dimensions = array<i32: 1>} : vector<16x16xi32>
    %c2_i32 = arith.constant 2 : i32
    %c0_i32_48 = arith.constant 0 : i32
    %258 = arith.cmpi eq, %c2_i32, %c0_i32_48 : i32
    %c1_i32_49 = arith.constant 1 : i32
    %259 = arith.select %258, %c1_i32_49, %c2_i32 : i32
    %260 = vector.broadcast %259 : i32 to vector<16x16xi32>
    %261 = arith.remsi %256, %260 : vector<16x16xi32>
    %c0_i32_50 = arith.constant 0 : i32
    %262 = vector.broadcast %c0_i32_50 : i32 to vector<16x16xi32>
    %263 = arith.cmpi ne, %261, %262 : vector<16x16xi32>
    %c0_i32_51 = arith.constant 0 : i32
    %264 = vector.broadcast %c0_i32_51 : i32 to vector<16x16xi32>
    %265 = arith.cmpi slt, %261, %264 : vector<16x16xi32>
    %c0_i32_52 = arith.constant 0 : i32
    %266 = arith.cmpi slt, %259, %c0_i32_52 : i32
    %267 = vector.broadcast %266 : i1 to vector<16x16xi1>
    %268 = vector.broadcast %267 : vector<16x16xi1> to vector<16x16xi1>
    %269 = arith.xori %265, %268 : vector<16x16xi1>
    %270 = arith.andi %269, %263 : vector<16x16xi1>
    %271 = vector.broadcast %259 : i32 to vector<16x16xi32>
    %272 = arith.addi %261, %271 : vector<16x16xi32>
    %273 = arith.select %270, %272, %261 : vector<16x16xi1>, vector<16x16xi32>
    %c2_i32_53 = arith.constant 2 : i32
    %c0_i32_54 = arith.constant 0 : i32
    %274 = arith.cmpi eq, %c2_i32_53, %c0_i32_54 : i32
    %c1_i32_55 = arith.constant 1 : i32
    %275 = arith.select %274, %c1_i32_55, %c2_i32_53 : i32
    %276 = vector.broadcast %275 : i32 to vector<16x16xi32>
    %277 = arith.remsi %257, %276 : vector<16x16xi32>
    %c0_i32_56 = arith.constant 0 : i32
    %278 = vector.broadcast %c0_i32_56 : i32 to vector<16x16xi32>
    %279 = arith.cmpi ne, %277, %278 : vector<16x16xi32>
    %c0_i32_57 = arith.constant 0 : i32
    %280 = vector.broadcast %c0_i32_57 : i32 to vector<16x16xi32>
    %281 = arith.cmpi slt, %277, %280 : vector<16x16xi32>
    %c0_i32_58 = arith.constant 0 : i32
    %282 = arith.cmpi slt, %275, %c0_i32_58 : i32
    %283 = vector.broadcast %282 : i1 to vector<16x16xi1>
    %284 = vector.broadcast %283 : vector<16x16xi1> to vector<16x16xi1>
    %285 = arith.xori %281, %284 : vector<16x16xi1>
    %286 = arith.andi %285, %279 : vector<16x16xi1>
    %287 = vector.broadcast %275 : i32 to vector<16x16xi32>
    %288 = arith.addi %277, %287 : vector<16x16xi32>
    %289 = arith.select %286, %288, %277 : vector<16x16xi1>, vector<16x16xi32>
    %290 = arith.cmpi eq, %273, %289 : vector<16x16xi32>
    %291 = arith.extui %290 : vector<16x16xi1> to vector<16x16xi32>
    %292 = arith.sitofp %291 : vector<16x16xi32> to vector<16x16xf32>
    %cst_59 = arith.constant dense<0.000000e+00> : vector<16x1xf32>
    %293 = tpu.matmul %292, %255, %cst_59 {dimension_numbers = #tpu.dot_dimension_numbers<[1], [0], [0], [1], [0, 0, 1, 1], [], []>} : vector<16x16xf32>, vector<16x1xf32>, vector<16x1xf32> -> vector<16x1xf32>
    %294 = arith.divf %255, %293 : vector<16x1xf32>
    %295 = vector.broadcast %294 : vector<16x1xf32> to vector<16x32xf32>
    %296 = arith.mulf %240, %295 : vector<16x32xf32>
    %cst_60 = arith.constant dense<0.000000e+00> : vector<16x128xf32>
    %297 = tpu.matmul %296, %2, %cst_60 {dimension_numbers = #tpu.dot_dimension_numbers<[1], [0], [0], [1], [0, 0, 1, 1], [], []>} : vector<16x32xf32>, vector<32x128xf32>, vector<16x128xf32> -> vector<16x128xf32>
    %298 = vector.broadcast %11 : vector<1x128xf32> to vector<16x128xf32>
    %299 = arith.addf %297, %298 : vector<16x128xf32>
    %cst_61 = arith.constant 0.000000e+00 : f32
    %300 = vector.broadcast %cst_61 : f32 to vector<16x128xf32>
    %301 = arith.maximumf %299, %300 : vector<16x128xf32>
    %cst_62 = arith.constant dense<0.000000e+00> : vector<16x32xf32>
    %302 = tpu.matmul %301, %3, %cst_62 {dimension_numbers = #tpu.dot_dimension_numbers<[1], [0], [0], [1], [0, 0, 1, 1], [], []>} : vector<16x128xf32>, vector<128x32xf32>, vector<16x32xf32> -> vector<16x32xf32>
    %303 = vector.broadcast %12 : vector<1x32xf32> to vector<16x32xf32>
    %304 = arith.addf %302, %303 : vector<16x32xf32>
    %305 = tpu.concatenate %296, %304 in 1 : vector<16x32xf32>, vector<16x32xf32> -> vector<16x64xf32>
    %306 = tpu.iota {dimensions = array<i32: 0>} : vector<2x16xi32>
    %307 = tpu.iota {dimensions = array<i32: 1>} : vector<2x16xi32>
    %c2_i32_63 = arith.constant 2 : i32
    %c0_i32_64 = arith.constant 0 : i32
    %308 = arith.cmpi eq, %c2_i32_63, %c0_i32_64 : i32
    %c1_i32_65 = arith.constant 1 : i32
    %309 = arith.select %308, %c1_i32_65, %c2_i32_63 : i32
    %310 = vector.broadcast %309 : i32 to vector<2x16xi32>
    %311 = arith.remsi %307, %310 : vector<2x16xi32>
    %c0_i32_66 = arith.constant 0 : i32
    %312 = vector.broadcast %c0_i32_66 : i32 to vector<2x16xi32>
    %313 = arith.cmpi ne, %311, %312 : vector<2x16xi32>
    %c0_i32_67 = arith.constant 0 : i32
    %314 = vector.broadcast %c0_i32_67 : i32 to vector<2x16xi32>
    %315 = arith.cmpi slt, %311, %314 : vector<2x16xi32>
    %c0_i32_68 = arith.constant 0 : i32
    %316 = arith.cmpi slt, %309, %c0_i32_68 : i32
    %317 = vector.broadcast %316 : i1 to vector<2x16xi1>
    %318 = vector.broadcast %317 : vector<2x16xi1> to vector<2x16xi1>
    %319 = arith.xori %315, %318 : vector<2x16xi1>
    %320 = arith.andi %319, %313 : vector<2x16xi1>
    %321 = vector.broadcast %309 : i32 to vector<2x16xi32>
    %322 = arith.addi %311, %321 : vector<2x16xi32>
    %323 = arith.select %320, %322, %311 : vector<2x16xi1>, vector<2x16xi32>
    %324 = arith.cmpi eq, %323, %306 : vector<2x16xi32>
    %325 = arith.extui %324 : vector<2x16xi1> to vector<2x16xi32>
    %326 = arith.sitofp %325 : vector<2x16xi32> to vector<2x16xf32>
    %cst_69 = arith.constant dense<0.000000e+00> : vector<2x64xf32>
    %327 = tpu.matmul %326, %305, %cst_69 {dimension_numbers = #tpu.dot_dimension_numbers<[1], [0], [0], [1], [0, 0, 1, 1], [], []>} : vector<2x16xf32>, vector<16x64xf32>, vector<2x64xf32> -> vector<2x64xf32>
    %cst_70 = arith.constant dense<0.000000e+00> : vector<2x4xf32>
    %328 = tpu.matmul %327, %5, %cst_70 {dimension_numbers = #tpu.dot_dimension_numbers<[1], [0], [0], [1], [0, 0, 1, 1], [], []>} : vector<2x64xf32>, vector<64x4xf32>, vector<2x4xf32> -> vector<2x4xf32>
    %329 = vector.broadcast %13 : vector<1x4xf32> to vector<2x4xf32>
    %330 = arith.addf %328, %329 : vector<2x4xf32>
    %c0_71 = arith.constant 0 : index
    %c0_72 = arith.constant 0 : index
    %331 = vector.load %arg3[%c0_71, %c0_72] : memref<2x4xf32, #tpu.memory_space<vmem>>, vector<2x4xf32>
    tpu.vector_store %arg3[%c0_71, %c0_72], %330 {strides = array<i32>} : memref<2x4xf32, #tpu.memory_space<vmem>>, vector<2x4xf32>,
    return
  }
}

</mosaic_0001>

<bundles_post_ra>
// kernel: tpu_custom_call.1
= control target key start
LH: loop header
LB: loop body
LE: loop exit
PB: predicated region body
PF: predicated region fallthrough
CT: control target
= control target key end

     0   :  { %8 = vsyncpa [#allocation3], 0  ;;  %s2527_s0 = inlined_call_operand.hbm [shape: f32[16,32], index: 0, kind: input, shape index: {}]   ;;  %s2528_s1 = inlined_call_operand.hbm [shape: f32[320,128], index: 1, kind: input, shape index: {}]   ;;  %s2529_s2 = inlined_call_operand.hbm [shape: f32[8,128], index: 2, kind: input, shape index: {}]   ;;  %s2530_s3 = inlined_call_operand.hbm [shape: f32[2,4], index: 3, kind: output, shape index: {}]  }
   0x1   :  { %9 = vsyncpa [#allocation6], 0 }
   0x2   :  { %10 = vsyncpa [#allocation4], 0  ;;  %s2249_s12 = smov [#allocation5]   ;;  %s2250_s14 = smov [#allocation2]  }
   0x3   :  { %s28_s13 = sshll.u32 %s2249_s12, 4  ;;  %s16_s15 = sshll.u32 %s2250_s14, 4  ;;  %s29_s13 = int_to_ptr.vmem [resolvable:$true] %s28_s13  ;;  %s17_s15 = int_to_ptr.vmem [resolvable:$true] %s16_s15 }
   0x4   :  { %s2171_s16 = scalar_lea.vmem %s29_s13, 5120  ;;  %p2176_p1 = scmp.lt.s32.totalorder %s29_s13, %s29_s13 }
   0x5   :  { %p2172_p0 = scmp.ne.s32.totalorder %s29_s13, %s2171_s16  ;;  %p2177_p2 = scmp.lt.s32.totalorder %s2171_s16, %s2171_s16 }
   0x7   :  { %p2178_p3 = por %p2177_p2, %p2176_p1 }
   0x9   :  { %p2179_p4 = pnand %p2178_p3, %p2172_p0 }
   0xb   :  { %2182 = shalt.err (!%p2179_p4)
}
   0xc   :  { %s2251_s17 = smov 128   ;;  %s2252_s18 = smov 8  }
   0xd   :  { %34 = dma.hbm_to_vmem [thread:$0]  %s2528_s1, 5120, %s29_s13, [#allocation6], %s2251_s17, %s2251_s17, %s2252_s18  }
   0xe   :  { %s2191_s21 = scalar_lea.vmem %s17_s15, 256  ;;  %p2196_p6 = scmp.lt.s32.totalorder %s17_s15, %s17_s15 }
   0xf   :  { %p2192_p5 = scmp.ne.s32.totalorder %s17_s15, %s2191_s21  ;;  %p2197_p7 = scmp.lt.s32.totalorder %s2191_s21, %s2191_s21 }
  0x11   :  { %p2198_p8 = por %p2197_p7, %p2196_p6 }
  0x13   :  { %p2199_p9 = pnand %p2198_p8, %p2192_p5 }
  0x15   :  { %2202 = shalt.err (!%p2199_p9)
}
  0x16   :  { %22 = dma.hbm_to_vmem [thread:$0]  %s2527_s0, 256, %s17_s15, [#allocation3], %s2251_s17, %s2251_s17, %s2252_s18  }
  0x17   :  { %s2253_s24 = smov [#allocation7]  }
  0x18   :  { %s41_s25 = sshll.u32 %s2253_s24, 4  ;;  %s42_s25 = int_to_ptr.vmem [resolvable:$true] %s41_s25 }
  0x19   :  { %s2211_s26 = scalar_lea.vmem %s42_s25, 128  ;;  %p2216_p11 = scmp.lt.s32.totalorder %s42_s25, %s42_s25 }
  0x1a   :  { %p2212_p10 = scmp.ne.s32.totalorder %s42_s25, %s2211_s26  ;;  %p2217_p12 = scmp.lt.s32.totalorder %s2211_s26, %s2211_s26 }
  0x1c   :  { %p2218_p13 = por %p2217_p12, %p2216_p11 }
  0x1e   :  { %p2219_p0 = pnand %p2218_p13, %p2212_p10 }
  0x20   :  { %2222 = shalt.err (!%p2219_p0)
}
  0x21   :  { %44 = dma.hbm_to_vmem [thread:$0]  %s2529_s2, 128, %s42_s25, [#allocation6]  }
  0x22   :  { %2243 = dma.done.wait [#allocation3], 256  }
  0x23   :  { %2244 = vsyncadd [#allocation3], 4294967040 }
  0x24   :  { %2245 = dma.done.wait [#allocation6], 5248  }
  0x25   :  { %2246 = vsyncadd [#allocation6], 4294962048  ;;  %vm104_vm0 = vcmask 261120   ;;  %v102_v0 = vld [vmem:[#allocation2] sm:$0xff]  ;;  %v103_v1 = vld [vmem:[#allocation2 + $0x8] sm:$0xff]  ;;  %v2254_v16 = vmov 0.0   ;;  %v229_v41 = vlaneseq }
  0x26   :  { %v105_v2 = vsel %vm104_vm0, %v102_v0, 0.0  ;;  %v108_v3 = vsel %vm104_vm0, %v103_v1, 0.0  ;;  %v57_v14 = vld [vmem:[#allocation5 + $0x18] sm:$0xff]  ;;  %v56_v15 = vld [vmem:[#allocation5 + $0x10] sm:$0xff]  ;;  %1892 = vmatprep.subr.mxu1 %v2254_v16  ;;  %v55_v17 = vld [vmem:[#allocation5 + $0x8] sm:$0xff]  ;;  %vm2255_vm1 = vmmov 0  }
  0x27   :  { %106 = vadd.xlane.f32.xlu0 %v105_v2  ;;  %1881 = vmatprep.subr.mxu0 %v57_v14  ;;  %v2294_v18 = vld [vmem:[#allocation5 + $0x38] sm:$0xff]  ;;  %v54_v19 = vld [vmem:[#allocation5] sm:$0xff]  ;;  %v2298_v20 = vld [vmem:[#allocation5 + $0x30] sm:$0xff]  ;;  %v2337_v42 = vand.u32 127, %v229_v41  ;;  %s2256_s0 = smov 32   ;;  %s2257_s2 = smov 64  }
  0x28   :  { %1882 = vmatpush3.msra.mxu0 %v57_v14  ;;  %1893 = vmatpush3.msra.mxu1 %v2294_v18  ;;  %v2302_v21 = vld [vmem:[#allocation5 + $0x28] sm:$0xff]  ;;  %v2305_v22 = vld [vmem:[#allocation5 + $0x20] sm:$0xff]  ;;  %vm1139_vm4 = vcmask 1041408   ;;  %vm1141_vm5 = vcmask 1043456   ;;  %vm1143_vm6 = vcmask 1045504   ;;  %vm1307_vm8 = vcmask 130048  }
  0x29   :  { %1883 = vmatprep.subr.mxu0 %v56_v15  ;;  %1894 = vmatprep.subr.mxu1 %v2254_v16  ;;  %v1753_v30 = vld [vmem:[#allocation7] ss:$0 sm:$0xff]  ;;  %v1754_v32 = vld [vmem:[#allocation7 + $0x1] ss:$0 sm:$0xff]  ;;  %v1755_v43 = vld [vmem:[#allocation7 + $0x2] ss:$0 sm:$0xff] }
  0x2a   :  { %1884 = vmatpush3.msra.mxu0 %v56_v15  ;;  %1895 = vmatpush3.msra.mxu1 %v2298_v20  ;;  %v235_v44 = vand.u32 31, %v2337_v42  ;;  %vm244_vm3 = vcmp.lt.s32.totalorder %v2337_v42, 16  ;;  %vm1661_vm11 = vcmask 523264   ;;  %s2259_s28 = smov [#allocation8]   ;;  %vm1735_vm12 = vcmask 25600  }
  0x2b   :  { %109 = vadd.xlane.f32.xlu0 %v108_v3  ;;  %1885 = vmatprep.subr.mxu0 %v55_v17  ;;  %s1743_s29 = sshll.u32 %s2259_s28, 4  ;;  %s1744_s29 = int_to_ptr.vmem [resolvable:$true] %s1743_s29 }
  0x2c   :  { %1886 = vmatpush3.msra.mxu0 %v55_v17  ;;  %1896 = vmatprep.subr.mxu1 %v2254_v16  ;;  %vm243_vm2 = vcmp.lt.s32.totalorder %v235_v44, 16  ;;  %s2223_s30 = scalar_lea.vmem %s1744_s29, 32  ;;  %p2228_p2 = scmp.lt.s32.totalorder %s1744_s29, %s1744_s29 }
  0x2d   :  { %1887 = vmatprep.subr.mxu0 %v54_v19  ;;  %1897 = vmatpush3.msra.mxu1 %v2302_v21  ;;  %p2224_p1 = scmp.ne.s32.totalorder %s1744_s29, %s2223_s30  ;;  %p2229_p3 = scmp.lt.s32.totalorder %s2223_s30, %s2223_s30 }
  0x2e   :  { %1888 = vmatpush3.msra.mxu0 %v54_v19  ;;  %1898 = vmatprep.subr.mxu1 %v2254_v16 }
  0x2f   :  { %1903 = vmatprep.subr.mxu0 %v2254_v16  ;;  %1900 = vmatprep.mubr.msk.f32.mxu1 %vm2255_vm1, %v2254_v16  ;;  %p2230_p4 = por %p2229_p3, %p2228_p2 }
  0x30   :  { %1899 = vmatpush3.msra.mxu1 %v2305_v22 }
  0x31   :  { %1901 = vmatmul.mubr.f32.vlgmr.msra.gmra.mxu1 %v2254_v16  ;;  %1914 = vmatprep.subr.mxu1 %v2254_v16  ;;  %p2231_p5 = pnand %p2230_p4, %p2224_p1 }
  0x32   :  { %1915 = vmatpush3.msra.mxu1 %v2294_v18  ;;  %1922 = vmatprep.mubr.msk.f32.mxu1 %vm2255_vm1, %v2254_v16 }
  0x33   :  { %1916 = vmatprep.subr.mxu1 %v2254_v16 }
  0x34   :  { %1917 = vmatpush3.msra.mxu1 %v2298_v20 }
  0x35   :  { %1918 = vmatprep.subr.mxu1 %v2254_v16 }
  0x36   :  { %1919 = vmatpush3.msra.mxu1 %v2302_v21 }
  0x37   :  { %1920 = vmatprep.subr.mxu1 %v2254_v16 }
  0x38   :  { %1921 = vmatpush3.msra.mxu1 %v2305_v22 }
  0x39   :  { %1936 = vmatprep.subr.mxu1 %v2254_v16 }
  0xb0   :  { %v107_v4 = vpop.xlane.xlu0 %106 }
  0xb1   :  { %v112_v5 = vmul.f32 0.03125, %v107_v4 }
  0xb3   :  { %v114_v6 = vsub.f32 %v102_v0, %v112_v5 }
  0xb4   :  { %v110_v7 = vpop.xlane.xlu0 %109 }
  0xb5   :  { %v113_v8 = vmul.f32 0.03125, %v110_v7  ;;  %v116_v9 = vmul.f32 %v114_v6, %v114_v6 }
  0xb7   :  { %v115_v10 = vsub.f32 %v103_v1, %v113_v8  ;;  %v118_v11 = vsel %vm104_vm0, %v116_v9, 0.0 }
  0xb8   :  { %119 = vadd.xlane.f32.xlu1 %v118_v11 }
  0xb9   :  { %v117_v12 = vmul.f32 %v115_v10, %v115_v10 }
  0xbb   :  { %v121_v13 = vsel %vm104_vm0, %v117_v12, 0.0 }
  0xbc   :  { %122 = vadd.xlane.f32.xlu1 %v121_v13 }
  0xf1   :  { %v318_v39 = vpop.f32.mrf.mxu1 }
  0xf3   :  { %v1902_v40 = vpop.f32.mrf.mxu1 }
 0x141   :  { %v120_v23 = vpop.xlane.xlu1 %119 }
 0x142   :  { %v124_v24 = vmul.f32 0.03125, %v120_v23 }
 0x144   :  { %v126_v25 = vadd.f32 1e-05, %v124_v24 }
 0x145   :  { %v123_v26 = vpop.xlane.xlu1 %122 }
 0x146   :  { %2083 = vrsqrt.f32 %v126_v25  ;;  %v125_v27 = vmul.f32 0.03125, %v123_v26 }
 0x148   :  { %v127_v28 = vadd.f32 1e-05, %v125_v27 }
 0x14a   :  { %2085 = vrsqrt.f32 %v127_v28 }
 0x153   :  { %v2084_v29 = vpop.eup %2083 }
 0x154   :  { %v130_v31 = vmul.f32 %v2084_v29, %v114_v6 }
 0x156   :  { %v136_v33 = vmul.f32 %v1753_v30, %v130_v31 }
 0x157   :  { %v2086_v34 = vpop.eup %2085 }
 0x158   :  { %v131_v35 = vmul.f32 %v2086_v34, %v115_v10  ;;  %v142_v36 = vadd.f32 %v1754_v32, %v136_v33 }
 0x15a   :  { %v137_v37 = vmul.f32 %v1753_v30, %v131_v35  ;;  %1889 = vmatprep.mubr.msk.f32.mxu0 %vm104_vm0, %v142_v36 }
 0x15c   :  { %v143_v38 = vadd.f32 %v1754_v32, %v137_v37 }
 0x15e   :  { %1890 = vmatmul.mubr.msk.f32.vlgmr.msra.gmra.mxu0 %vm104_vm0, %v143_v38 }
 0x15f   :  { %1904 = vmatpush3.msra.mxu0 %v2294_v18  ;;  %1911 = vmatprep.mubr.msk.f32.mxu0 %vm2255_vm1, %v2254_v16 }
 0x160   :  { %1905 = vmatprep.subr.mxu0 %v2254_v16 }
 0x161   :  { %1906 = vmatpush3.msra.mxu0 %v2298_v20 }
 0x162   :  { %1907 = vmatprep.subr.mxu0 %v2254_v16 }
 0x163   :  { %1908 = vmatpush3.msra.mxu0 %v2302_v21 }
 0x164   :  { %1909 = vmatprep.subr.mxu0 %v2254_v16 }
 0x165   :  { %1910 = vmatpush3.msra.mxu0 %v2305_v22 }
 0x166   :  { %1925 = vmatprep.subr.mxu0 %v2254_v16 }
 0x21e   :  { %v1891_v45 = vpop.f32.mrf.mxu0 }
 0x21f   :  { %v226_v46 = vadd.f32 %v1891_v45, %v1755_v43 }
 0x220   :  { %v220_v47 = vpop.f32.mrf.mxu0 }
 0x221   :  { %v221_v48 = vadd.f32 %v1755_v43, %v220_v47  ;;  %v246_v49 = vrot.slane %v226_v46, 6  ;;  %v347_v50 = vrot.slane %v226_v46, 2 }
 0x223   :  { %v2340_v51 = vsel %vm243_vm2, %v221_v48, %v246_v49  ;;  %v2342_v52 = vsel %vm243_vm2, %v221_v48, %v347_v50  ;;  %v671_v53 = vrot.slane %v221_v48, 6  ;;  %v778_v54 = vrot.slane %v221_v48, 2 }
 0x224   :  { %v322_v55 = vadd.f32 %v318_v39, %v2340_v51 }
 0x225   :  { %v2345_v56 = vsel %vm243_vm2, %v226_v46, %v671_v53  ;;  %v2347_v57 = vsel %vm243_vm2, %v226_v46, %v778_v54 }
 0x226   :  { %2087 = vtanh.f32 %v322_v55  ;;  %v1758_v59 = vmul.f32 -1.442695, %v322_v55 }
 0x228   :  { %2089 = vpow2.f32 %v1758_v59 }
 0x233   :  { %v2088_v58 = vpop.eup %2087 }
 0x234   :  { %332 = vrot.lane.b32.xlu0 %v2088_v58, %s2256_s0 }
 0x235   :  { %v2090_v60 = vpop.eup %2089 }
 0x236   :  { %v326_v61 = vadd.f32 1.0, %v2090_v60 }
 0x238   :  { %2091 = vrcp.f32 %v326_v61 }
 0x245   :  { %v2092_v62 = vpop.eup %2091 }
 0x246   :  { %v330_v1 = vmul.f32 0.0, %v2092_v62 }
 0x2a6   :  { %v333_v63 = vpop.permute.xlu0 %332 }
 0x2a7   :  { %v335_v0 = vmul.f32 %v2092_v62, %v333_v63 }
 0x2a9   :  { %337 = vrot.lane.b32.xlu1 %v335_v0, %s2256_s0 }
 0x31b   :  { %v338_v2 = vpop.permute.xlu1 %337 }
 0x31c   :  { %v340_v3 = vadd.f32 %v338_v2, %v330_v1 }
 0x31e   :  { %2093 = vtanh.f32 %v340_v3  ;;  %v437_v24 = vrot.slane %v340_v3, 6 }
 0x32b   :  { %v2094_v4 = vpop.eup %2093 }
 0x32c   :  { %343 = vrot.lane.b32.xlu1 %v2094_v4, %s2256_s0 }
 0x39e   :  { %v344_v5 = vpop.permute.xlu1 %343 }
 0x39f   :  { %v346_v6 = vmul.f32 %v2092_v62, %v344_v5 }
 0x3a1   :  { %351 = vrot.lane.b32.xlu1 %v346_v6, %s2257_s2 }
 0x413   :  { %v2353_v7 = vpop.permute.xlu1 %351 }
 0x414   :  { %1912 = vmatmul.mubr.msk.f32.vlgmr.msra.gmra.mxu0 %vm104_vm0, %v2353_v7 }
 0x415   :  { %1926 = vmatpush3.msra.mxu0 %v2294_v18  ;;  %1933 = vmatprep.mubr.msk.f32.mxu0 %vm2255_vm1, %v2254_v16 }
 0x416   :  { %1927 = vmatprep.subr.mxu0 %v2254_v16 }
 0x417   :  { %1928 = vmatpush3.msra.mxu0 %v2298_v20 }
 0x418   :  { %1929 = vmatprep.subr.mxu0 %v2254_v16 }
 0x419   :  { %1930 = vmatpush3.msra.mxu0 %v2302_v21 }
 0x41a   :  { %1931 = vmatprep.subr.mxu0 %v2254_v16 }
 0x41b   :  { %1932 = vmatpush3.msra.mxu0 %v2305_v22 }
 0x41c   :  { %1947 = vmatprep.subr.mxu0 %v2254_v16 }
 0x4d4   :  { %v421_v8 = vpop.f32.mrf.mxu0 }
 0x4d5   :  { %v426_v9 = vrot.slane %v421_v8, 6 }
 0x4d6   :  { %v1913_v10 = vpop.f32.mrf.mxu0 }
 0x4d7   :  { %v428_v11 = vadd.f32 %v426_v9, %v2342_v52 }
 0x4d9   :  { %2095 = vtanh.f32 %v428_v11  ;;  %v1760_v13 = vmul.f32 -1.442695, %v428_v11 }
 0x4db   :  { %2097 = vpow2.f32 %v1760_v13 }
 0x4e6   :  { %v2096_v12 = vpop.eup %2095 }
 0x4e7   :  { %441 = vrot.lane.b32.xlu0 %v2096_v12, %s2256_s0 }
 0x4e8   :  { %v2098_v14 = vpop.eup %2097 }
 0x4e9   :  { %v432_v15 = vadd.f32 1.0, %v2098_v14 }
 0x4eb   :  { %2099 = vrcp.f32 %v432_v15 }
 0x4f8   :  { %v2100_v17 = vpop.eup %2099 }
 0x4f9   :  { %v439_v25 = vmul.f32 %v2100_v17, %v437_v24 }
 0x559   :  { %v442_v19 = vpop.permute.xlu0 %441 }
 0x55a   :  { %v444_v23 = vmul.f32 %v2100_v17, %v442_v19 }
 0x55c   :  { %446 = vrot.lane.b32.xlu1 %v444_v23, %s2256_s0 }
 0x5ce   :  { %v447_v26 = vpop.permute.xlu1 %446 }
 0x5cf   :  { %v449_v27 = vadd.f32 %v447_v26, %v439_v25 }
 0x5d1   :  { %2101 = vtanh.f32 %v449_v27  ;;  %v544_v46 = vrot.slane %v449_v27, 6 }
 0x5de   :  { %v2102_v28 = vpop.eup %2101 }
 0x5df   :  { %452 = vrot.lane.b32.xlu0 %v2102_v28, %s2256_s0 }
 0x651   :  { %v453_v29 = vpop.permute.xlu0 %452 }
 0x652   :  { %v455_v30 = vmul.f32 %v2100_v17, %v453_v29 }
 0x654   :  { %v457_v31 = vrot.slane %v455_v30, 2 }
 0x656   :  { %458 = vrot.lane.b32.xlu1 %v457_v31, %s2257_s2 }
 0x6c8   :  { %v2372_v32 = vpop.permute.xlu1 %458 }
 0x6c9   :  { %1923 = vmatmul.mubr.msk.f32.vlgmr.msra.gmra.mxu1 %vm104_vm0, %v2372_v32 }
 0x6ca   :  { %1937 = vmatpush3.msra.mxu1 %v2294_v18  ;;  %1944 = vmatprep.mubr.msk.f32.mxu1 %vm2255_vm1, %v2254_v16 }
 0x6cb   :  { %1938 = vmatprep.subr.mxu1 %v2254_v16 }
 0x6cc   :  { %1939 = vmatpush3.msra.mxu1 %v2298_v20 }
 0x6cd   :  { %1940 = vmatprep.subr.mxu1 %v2254_v16 }
 0x6ce   :  { %1941 = vmatpush3.msra.mxu1 %v2302_v21 }
 0x6cf   :  { %1942 = vmatprep.subr.mxu1 %v2254_v16 }
 0x6d0   :  { %1943 = vmatpush3.msra.mxu1 %v2305_v22 }
 0x6d1   :  { %1958 = vmatprep.subr.mxu1 %v2254_v16 }
 0x789   :  { %v528_v33 = vpop.f32.mrf.mxu1 }
 0x78a   :  { %v533_v34 = vrot.slane %v528_v33, 4 }
 0x78b   :  { %v1924_v35 = vpop.f32.mrf.mxu1 }
 0x78c   :  { %v535_v36 = vadd.f32 %v533_v34, %v2340_v51 }
 0x78e   :  { %2103 = vtanh.f32 %v535_v36  ;;  %v1762_v38 = vmul.f32 -1.442695, %v535_v36 }
 0x790   :  { %2105 = vpow2.f32 %v1762_v38 }
 0x79b   :  { %v2104_v37 = vpop.eup %2103 }
 0x79c   :  { %548 = vrot.lane.b32.xlu0 %v2104_v37, %s2256_s0 }
 0x79d   :  { %v2106_v39 = vpop.eup %2105 }
 0x79e   :  { %v539_v40 = vadd.f32 1.0, %v2106_v39 }
 0x7a0   :  { %2107 = vrcp.f32 %v539_v40 }
 0x7ad   :  { %v2108_v43 = vpop.eup %2107 }
 0x7ae   :  { %v546_v47 = vmul.f32 %v2108_v43, %v544_v46 }
 0x80e   :  { %v549_v44 = vpop.permute.xlu0 %548 }
 0x80f   :  { %v551_v45 = vmul.f32 %v2108_v43, %v549_v44 }
 0x811   :  { %553 = vrot.lane.b32.xlu1 %v551_v45, %s2256_s0 }
 0x883   :  { %v554_v48 = vpop.permute.xlu1 %553 }
 0x884   :  { %v556_v49 = vadd.f32 %v554_v48, %v546_v47 }
 0x886   :  { %2109 = vtanh.f32 %v556_v49  ;;  %v651_v5 = vrot.slane %v556_v49, 6 }
 0x893   :  { %v2110_v50 = vpop.eup %2109 }
 0x894   :  { %559 = vrot.lane.b32.xlu0 %v2110_v50, %s2256_s0 }
 0x906   :  { %v560_v51 = vpop.permute.xlu0 %559 }
 0x907   :  { %v562_v53 = vmul.f32 %v2108_v43, %v560_v51 }
 0x909   :  { %v564_v54 = vrot.slane %v562_v53, 4 }
 0x90b   :  { %565 = vrot.lane.b32.xlu1 %v564_v54, %s2257_s2 }
 0x97d   :  { %v2391_v55 = vpop.permute.xlu1 %565 }
 0x97e   :  { %1934 = vmatmul.mubr.msk.f32.vlgmr.msra.gmra.mxu0 %vm104_vm0, %v2391_v55 }
 0x97f   :  { %1948 = vmatpush3.msra.mxu0 %v2294_v18  ;;  %1955 = vmatprep.mubr.msk.f32.mxu0 %vm2255_vm1, %v2254_v16 }
 0x980   :  { %1949 = vmatprep.subr.mxu0 %v2254_v16 }
 0x981   :  { %1950 = vmatpush3.msra.mxu0 %v2298_v20 }
 0x982   :  { %1951 = vmatprep.subr.mxu0 %v2254_v16 }
 0x983   :  { %1952 = vmatpush3.msra.mxu0 %v2302_v21 }
 0x984   :  { %1953 = vmatprep.subr.mxu0 %v2254_v16 }
 0x985   :  { %1954 = vmatpush3.msra.mxu0 %v2305_v22 }
 0x986   :  { %1969 = vmatprep.subr.mxu0 %v2254_v16 }
 0xa3e   :  { %v635_v58 = vpop.f32.mrf.mxu0 }
 0xa3f   :  { %v640_v59 = vrot.slane %v635_v58, 2 }
 0xa40   :  { %v1935_v60 = vpop.f32.mrf.mxu0 }
 0xa41   :  { %v642_v61 = vadd.f32 %v640_v59, %v2342_v52 }
 0xa43   :  { %2111 = vtanh.f32 %v642_v61  ;;  %v1764_v63 = vmul.f32 -1.442695, %v642_v61 }
 0xa45   :  { %2113 = vpow2.f32 %v1764_v63 }
 0xa50   :  { %v2112_v62 = vpop.eup %2111 }
 0xa51   :  { %655 = vrot.lane.b32.xlu0 %v2112_v62, %s2256_s0 }
 0xa52   :  { %v2114_v0 = vpop.eup %2113 }
 0xa53   :  { %v646_v1 = vadd.f32 1.0, %v2114_v0 }
 0xa55   :  { %2115 = vrcp.f32 %v646_v1 }
 0xa62   :  { %v2116_v2 = vpop.eup %2115 }
 0xa63   :  { %v653_v6 = vmul.f32 %v2116_v2, %v651_v5 }
 0xac3   :  { %v656_v3 = vpop.permute.xlu0 %655 }
 0xac4   :  { %v658_v4 = vmul.f32 %v2116_v2, %v656_v3 }
 0xac6   :  { %660 = vrot.lane.b32.xlu1 %v658_v4, %s2256_s0 }
 0xb38   :  { %v661_v8 = vpop.permute.xlu1 %660 }
 0xb39   :  { %v663_v9 = vadd.f32 %v661_v8, %v653_v6 }
 0xb3b   :  { %2117 = vtanh.f32 %v663_v9  ;;  %v759_v29 = vrot.slane %v663_v9, 6 }
 0xb48   :  { %v2118_v52 = vpop.eup %2117 }
 0xb49   :  { %666 = vrot.lane.b32.xlu0 %v2118_v52, %s2256_s0 }
 0xbbb   :  { %v667_v10 = vpop.permute.xlu0 %666 }
 0xbbc   :  { %v669_v11 = vmul.f32 %v2116_v2, %v667_v10 }
 0xbbe   :  { %v675_v12 = vrot.slane %v669_v11, 6 }
 0xbc0   :  { %676 = vrot.lane.b32.xlu1 %v675_v12, %s2257_s2 }
 0xc32   :  { %v2410_v13 = vpop.permute.xlu1 %676 }
 0xc33   :  { %1945 = vmatmul.mubr.msk.f32.vlgmr.msra.gmra.mxu1 %vm104_vm0, %v2410_v13 }
 0xc34   :  { %1959 = vmatpush3.msra.mxu1 %v2294_v18  ;;  %1966 = vmatprep.mubr.msk.f32.mxu1 %vm2255_vm1, %v2254_v16 }
 0xc35   :  { %1960 = vmatprep.subr.mxu1 %v2254_v16 }
 0xc36   :  { %1961 = vmatpush3.msra.mxu1 %v2298_v20 }
 0xc37   :  { %1962 = vmatprep.subr.mxu1 %v2254_v16 }
 0xc38   :  { %1963 = vmatpush3.msra.mxu1 %v2302_v21 }
 0xc39   :  { %1964 = vmatprep.subr.mxu1 %v2254_v16 }
 0xc3a   :  { %1965 = vmatpush3.msra.mxu1 %v2305_v22 }
 0xcf3   :  { %v746_v14 = vpop.f32.mrf.mxu1 }
 0xcf4   :  { %v750_v15 = vadd.f32 %v746_v14, %v2345_v56 }
 0xcf5   :  { %v1946_v17 = vpop.f32.mrf.mxu1 }
 0xcf6   :  { %2119 = vtanh.f32 %v750_v15  ;;  %v1766_v23 = vmul.f32 -1.442695, %v750_v15 }
 0xcf8   :  { %2121 = vpow2.f32 %v1766_v23 }
 0xd03   :  { %v2120_v19 = vpop.eup %2119 }
 0xd04   :  { %763 = vrot.lane.b32.xlu0 %v2120_v19, %s2256_s0 }
 0xd05   :  { %v2122_v24 = vpop.eup %2121 }
 0xd06   :  { %v754_v25 = vadd.f32 1.0, %v2122_v24 }
 0xd08   :  { %2123 = vrcp.f32 %v754_v25 }
 0xd15   :  { %v2124_v26 = vpop.eup %2123 }
 0xd16   :  { %v761_v30 = vmul.f32 %v2124_v26, %v759_v29 }
 0xd76   :  { %v764_v27 = vpop.permute.xlu0 %763 }
 0xd77   :  { %v766_v28 = vmul.f32 %v2124_v26, %v764_v27 }
 0xd79   :  { %768 = vrot.lane.b32.xlu1 %v766_v28, %s2256_s0 }
 0xdeb   :  { %v769_v31 = vpop.permute.xlu1 %768 }
 0xdec   :  { %v771_v33 = vadd.f32 %v769_v31, %v761_v30 }
 0xdee   :  { %2125 = vtanh.f32 %v771_v33 }
 0xdfb   :  { %v2126_v34 = vpop.eup %2125 }
 0xdfc   :  { %774 = vrot.lane.b32.xlu0 %v2126_v34, %s2256_s0 }
 0xe6e   :  { %v775_v35 = vpop.permute.xlu0 %774 }
 0xe6f   :  { %v777_v36 = vmul.f32 %v2124_v26, %v775_v35 }
 0xe71   :  { %782 = vrot.lane.b32.xlu1 %v777_v36, %s2257_s2 }
 0xee3   :  { %v2428_v37 = vpop.permute.xlu1 %782 }
 0xee4   :  { %1956 = vmatmul.mubr.msk.f32.vlgmr.msra.gmra.mxu0 %vm104_vm0, %v2428_v37 }
 0xee5   :  { %1970 = vmatpush3.msra.mxu0 %v2294_v18  ;;  %1977 = vmatprep.mubr.msk.f32.mxu0 %vm2255_vm1, %v2254_v16 }
 0xee6   :  { %1971 = vmatprep.subr.mxu0 %v2254_v16 }
 0xee7   :  { %1972 = vmatpush3.msra.mxu0 %v2298_v20 }
 0xee8   :  { %1973 = vmatprep.subr.mxu0 %v2254_v16 }
 0xee9   :  { %1974 = vmatpush3.msra.mxu0 %v2302_v21 }
 0xeea   :  { %1975 = vmatprep.subr.mxu0 %v2254_v16 }
 0xeeb   :  { %1976 = vmatpush3.msra.mxu0 %v2305_v22  ;;  %v868_v22 = vrot.slane %v771_v33, 6 }
 0xfa4   :  { %v852_v38 = vpop.f32.mrf.mxu0 }
 0xfa5   :  { %v857_v39 = vrot.slane %v852_v38, 6  ;;  %v84_v38 = vld [vmem:[#allocation5 + $0xf0] sm:$0xff] }
 0xfa6   :  { %v1957_v40 = vpop.f32.mrf.mxu0 }
 0xfa7   :  { %v859_v18 = vadd.f32 %v857_v39, %v2347_v57  ;;  %v83_v40 = vld [vmem:[#allocation5 + $0xe8] sm:$0xff] }
 0xfa9   :  { %2127 = vtanh.f32 %v859_v18  ;;  %v1768_v44 = vmul.f32 -1.442695, %v859_v18  ;;  %v82_v18 = vld [vmem:[#allocation5 + $0xe0] sm:$0xff] }
 0xfab   :  { %2129 = vpow2.f32 %v1768_v44 }
 0xfb6   :  { %v2128_v43 = vpop.eup %2127 }
 0xfb7   :  { %872 = vrot.lane.b32.xlu0 %v2128_v43, %s2256_s0 }
 0xfb8   :  { %v2130_v20 = vpop.eup %2129 }
 0xfb9   :  { %v863_v45 = vadd.f32 1.0, %v2130_v20 }
 0xfbb   :  { %2131 = vrcp.f32 %v863_v45 }
 0xfc8   :  { %v2132_v46 = vpop.eup %2131 }
 0xfc9   :  { %v870_v48 = vmul.f32 %v2132_v46, %v868_v22 }
0x1029   :  { %v873_v21 = vpop.permute.xlu0 %872 }
0x102a   :  { %v875_v47 = vmul.f32 %v2132_v46, %v873_v21 }
0x102c   :  { %877 = vrot.lane.b32.xlu1 %v875_v47, %s2256_s0 }
0x109e   :  { %v878_v49 = vpop.permute.xlu1 %877 }
0x109f   :  { %v880_v50 = vadd.f32 %v878_v49, %v870_v48  ;;  %v1116_v48 = vsel %vm244_vm3, %v2410_v13, %v2428_v37 }
0x10a1   :  { %2133 = vtanh.f32 %v880_v50  ;;  %v975_v8 = vrot.slane %v880_v50, 6  ;;  %v1117_v50 = vsel %vm244_vm3, %v2428_v37, %v2410_v13  ;;  %v1773_v13 = vld [vmem:[#allocation7 + $0x3] ss:$0 sm:$0xff] }
0x10ae   :  { %v2134_v51 = vpop.eup %2133 }
0x10af   :  { %883 = vrot.lane.b32.xlu0 %v2134_v51, %s2256_s0 }
0x1121   :  { %v884_v53 = vpop.permute.xlu0 %883 }
0x1122   :  { %v886_v54 = vmul.f32 %v2132_v46, %v884_v53 }
0x1124   :  { %v888_v58 = vrot.slane %v886_v54, 2 }
0x1126   :  { %889 = vrot.lane.b32.xlu1 %v888_v58, %s2257_s2 }
0x1198   :  { %v2446_v59 = vpop.permute.xlu1 %889 }
0x1199   :  { %1967 = vmatmul.mubr.msk.f32.vlgmr.msra.gmra.mxu1 %vm104_vm0, %v2446_v59  ;;  %v1118_v45 = vsel %vm244_vm3, %v2446_v59, %v2391_v55  ;;  %v1113_v47 = vsel %vm244_vm3, %v2391_v55, %v2446_v59 }
0x119a   :  { %v1131_v22 = vrot.slane %v1118_v45, 6  ;;  %v1125_v54 = vrot.slane %v1113_v47, 4 }
0x119c   :  { %v1145_v55 = vsel %vm1139_vm4, %v1117_v50, %v1131_v22  ;;  %v79_v50 = vld [vmem:[#allocation5 + $0xc8] sm:$0xff] }
0x1259   :  { %v959_v60 = vpop.f32.mrf.mxu1 }
0x125a   :  { %v964_v61 = vrot.slane %v959_v60, 4  ;;  %v1128_v60 = vrot.slane %v1116_v48, 2  ;;  %v81_v48 = vld [vmem:[#allocation5 + $0xd8] sm:$0xff] }
0x125b   :  { %v1968_v62 = vpop.f32.mrf.mxu1  ;;  %2009 = vmatprep.subr.mxu0 %v81_v48 }
0x125c   :  { %v966_v63 = vadd.f32 %v964_v61, %v2345_v56 }
0x125e   :  { %2135 = vtanh.f32 %v966_v63  ;;  %v1770_v1 = vmul.f32 -1.442695, %v966_v63 }
0x1260   :  { %2137 = vpow2.f32 %v1770_v1 }
0x126b   :  { %v2136_v0 = vpop.eup %2135 }
0x126c   :  { %979 = vrot.lane.b32.xlu0 %v2136_v0, %s2256_s0 }
0x126d   :  { %v2138_v2 = vpop.eup %2137 }
0x126e   :  { %v970_v3 = vadd.f32 1.0, %v2138_v2 }
0x1270   :  { %2139 = vrcp.f32 %v970_v3 }
0x127d   :  { %v2140_v4 = vpop.eup %2139 }
0x127e   :  { %v977_v9 = vmul.f32 %v2140_v4, %v975_v8 }
0x12de   :  { %v980_v5 = vpop.permute.xlu0 %979 }
0x12df   :  { %v982_v6 = vmul.f32 %v2140_v4, %v980_v5 }
0x12e1   :  { %984 = vrot.lane.b32.xlu1 %v982_v6, %s2256_s0 }
0x1353   :  { %v985_v52 = vpop.permute.xlu1 %984 }
0x1354   :  { %v987_v10 = vadd.f32 %v985_v52, %v977_v9 }
0x1356   :  { %2141 = vtanh.f32 %v987_v10  ;;  %v1082_v33 = vrot.slane %v987_v10, 6 }
0x1363   :  { %v2142_v56 = vpop.eup %2141 }
0x1364   :  { %990 = vrot.lane.b32.xlu0 %v2142_v56, %s2256_s0  ;;  %v2485_v56 = vshrl.u32 %v229_v41, 7 }
0x13d6   :  { %v991_v11 = vpop.permute.xlu0 %990 }
0x13d7   :  { %v993_v12 = vmul.f32 %v2140_v4, %v991_v11  ;;  %v1776_v4 = vld [vmem:[#allocation7 + $0x4] ss:$0 sm:$0xff]  ;;  %v1269_v11 = vand.u32 1, %v2485_v56 }
0x13d9   :  { %v995_v14 = vrot.slane %v993_v12, 4  ;;  %v2489_v12 = vand.u32 1, %v2337_v42 }
0x13db   :  { %996 = vrot.lane.b32.xlu1 %v995_v14, %s2257_s2  ;;  %vm1301_vm7 = vcmp.eq.s32.totalorder %v1269_v11, %v2489_v12  ;;  %vm1581_vm10 = vcmp.eq.s32.totalorder %v2489_v12, %v2485_v56 }
0x13dc   :  { %v1777_v14 = vsel %vm1301_vm7, 1.0, %v2254_v16 }
0x144d   :  { %v997_v15 = vpop.permute.xlu1 %996 }
0x144e   :  { %1978 = vmatmul.mubr.msk.f32.vlgmr.msra.gmra.mxu0 %vm104_vm0, %v997_v15  ;;  %v1119_v46 = vsel %vm244_vm3, %v997_v15, %v2372_v32  ;;  %v1110_v21 = vsel %vm244_vm3, %v2372_v32, %v997_v15 }
0x144f   :  { %v1134_v49 = vrot.slane %v1119_v46, 4  ;;  %v1122_v51 = vrot.slane %v1110_v21, 6  ;;  %v62_v21 = vld [vmem:[#allocation5 + $0x40] sm:$0xff]  ;;  %2010 = vmatpush3.msra.mxu0 %v81_v48 }
0x1451   :  { %v1146_v63 = vsel %vm1141_vm5, %v1145_v55, %v1134_v49  ;;  %v80_v49 = vld [vmem:[#allocation5 + $0xd0] sm:$0xff] }
0x1452   :  { %2011 = vmatprep.subr.mxu0 %v80_v49  ;;  %v72_v55 = vld [vmem:[#allocation5 + $0x90] sm:$0xff] }
0x1453   :  { %2012 = vmatpush3.msra.mxu0 %v80_v49 }
0x1454   :  { %2013 = vmatprep.subr.mxu0 %v79_v50 }
0x1455   :  { %2014 = vmatpush3.msra.mxu0 %v79_v50 }
0x150e   :  { %v1066_v17 = vpop.f32.mrf.mxu0 }
0x150f   :  { %v1071_v19 = vrot.slane %v1066_v17, 2 }
0x1510   :  { %v1979_v23 = vpop.f32.mrf.mxu0 }
0x1511   :  { %v1073_v24 = vadd.f32 %v1071_v19, %v2347_v57  ;;  %v85_v57 = vld [vmem:[#allocation5 + $0xf8] sm:$0xff] }
0x1512   :  { %1980 = vmatprep.subr.mxu1 %v85_v57 }
0x1513   :  { %2143 = vtanh.f32 %v1073_v24  ;;  %v1772_v26 = vmul.f32 -1.442695, %v1073_v24  ;;  %1981 = vmatpush3.msra.mxu1 %v85_v57 }
0x1514   :  { %1982 = vmatprep.subr.mxu1 %v84_v38 }
0x1515   :  { %2145 = vpow2.f32 %v1772_v26  ;;  %1983 = vmatpush3.msra.mxu1 %v84_v38 }
0x1516   :  { %1984 = vmatprep.subr.mxu1 %v83_v40 }
0x1517   :  { %1985 = vmatpush3.msra.mxu1 %v83_v40  ;;  %v65_v40 = vld [vmem:[#allocation5 + $0x58] sm:$0xff] }
0x1518   :  { %1986 = vmatprep.subr.mxu1 %v82_v18 }
0x1519   :  { %1987 = vmatpush3.msra.mxu1 %v82_v18  ;;  %v64_v18 = vld [vmem:[#allocation5 + $0x50] sm:$0xff] }
0x1520   :  { %v2144_v25 = vpop.eup %2143 }
0x1521   :  { %1086 = vrot.lane.b32.xlu0 %v2144_v25, %s2256_s0 }
0x1522   :  { %v2146_v27 = vpop.eup %2145 }
0x1523   :  { %v1077_v28 = vadd.f32 1.0, %v2146_v27 }
0x1525   :  { %2147 = vrcp.f32 %v1077_v28 }
0x1532   :  { %v2148_v29 = vpop.eup %2147 }
0x1533   :  { %v1084_v34 = vmul.f32 %v2148_v29, %v1082_v33 }
0x1593   :  { %v1087_v30 = vpop.permute.xlu0 %1086 }
0x1594   :  { %v1089_v31 = vmul.f32 %v2148_v29, %v1087_v30 }
0x1596   :  { %1091 = vrot.lane.b32.xlu1 %v1089_v31, %s2256_s0 }
0x1608   :  { %v1092_v35 = vpop.permute.xlu1 %1091 }
0x1609   :  { %v1094_v36 = vadd.f32 %v1092_v35, %v1084_v34  ;;  %v1264_v34 = vadd.s32 8, %v2485_v56  ;;  %v91_v56 = vld [vmem:[#allocation5 + $0x128] sm:$0xff] }
0x160b   :  { %2149 = vtanh.f32 %v1094_v36  ;;  %v1276_v35 = vand.u32 1, %v1264_v34  ;;  %v1787_v34 = vld [vmem:[#allocation7 + $0x7] ss:$0 sm:$0xff] }
0x160d   :  { %vm1302_vm9 = vcmp.eq.s32.totalorder %v1276_v35, %v2489_v12  ;;  %v90_v12 = vld [vmem:[#allocation5 + $0x120] sm:$0xff] }
0x160e   :  { %v1778_v38 = vsel %vm1302_vm9, 1.0, %v2254_v16 }
0x1618   :  { %v2150_v39 = vpop.eup %2149 }
0x1619   :  { %1097 = vrot.lane.b32.xlu0 %v2150_v39, %s2256_s0  ;;  %v2258_v39 = vmov 0  }
0x161a   :  { %2082 = vset.pattern.permute.xlu1 %v2258_v39  ;;  %2081 = vset.pattern.permute.xlu0 %v2258_v39 }
0x168b   :  { %v1098_v43 = vpop.permute.xlu0 %1097 }
0x168c   :  { %v1100_v44 = vmul.f32 %v2148_v29, %v1098_v43 }
0x168e   :  { %v1103_v20 = vrot.slane %v1100_v44, 6 }
0x1690   :  { %1104 = vrot.lane.b32.xlu1 %v1103_v20, %s2257_s2  ;;  %v63_v20 = vld [vmem:[#allocation5 + $0x48] sm:$0xff] }
0x1702   :  { %v1105_v53 = vpop.permute.xlu1 %1104 }
0x1703   :  { %v1107_v58 = vsel %vm244_vm3, %v2353_v7, %v1105_v53  ;;  %v1120_v32 = vsel %vm244_vm3, %v1105_v53, %v2353_v7  ;;  %v77_v53 = vld [vmem:[#allocation5 + $0xb8] sm:$0xff] }
0x1704   :  { %v1137_v59 = vrot.slane %v1120_v32, 2  ;;  %v1140_v61 = vsel %vm1139_vm4, %v1107_v58, %v1122_v51  ;;  %v78_v51 = vld [vmem:[#allocation5 + $0xc0] sm:$0xff]  ;;  %v75_v58 = vld [vmem:[#allocation5 + $0xa8] sm:$0xff] }
0x1705   :  { %v1142_v62 = vsel %vm1141_vm5, %v1140_v61, %v1125_v54  ;;  %2015 = vmatprep.subr.mxu0 %v78_v51  ;;  %v76_v54 = vld [vmem:[#allocation5 + $0xb0] sm:$0xff]  ;;  %v74_v32 = vld [vmem:[#allocation5 + $0xa0] sm:$0xff] }
0x1706   :  { %v2474_v0 = vsel %vm1143_vm6, %v1142_v62, %v1128_v60  ;;  %v2476_v1 = vsel %vm1143_vm6, %v1146_v63, %v1137_v59  ;;  %2016 = vmatpush3.msra.mxu0 %v78_v51  ;;  %v73_v60 = vld [vmem:[#allocation5 + $0x98] sm:$0xff]  ;;  %v71_v59 = vld [vmem:[#allocation5 + $0x88] sm:$0xff]  ;;  %v70_v61 = vld [vmem:[#allocation5 + $0x80] sm:$0xff] }
0x1707   :  { %1988 = vmatprep.mubr.msk.f32.mxu1 %vm104_vm0, %v2474_v0  ;;  %2017 = vmatprep.subr.mxu0 %v77_v53 }
0x1708   :  { %1989 = vmatmul.mubr.msk.f32.vlgmr.msra.gmra.mxu1 %vm104_vm0, %v2476_v1  ;;  %2018 = vmatpush3.msra.mxu0 %v77_v53 }
0x1709   :  { %1995 = vmatprep.mubr.msk.f32.mxu1 %vm1307_vm8, %v1777_v14  ;;  %2019 = vmatprep.subr.mxu0 %v76_v54 }
0x170a   :  { %2020 = vmatpush3.msra.mxu0 %v76_v54 }
0x170b   :  { %2021 = vmatprep.subr.mxu0 %v75_v58 }
0x170c   :  { %2022 = vmatpush3.msra.mxu0 %v75_v58 }
0x170d   :  { %2023 = vmatprep.subr.mxu0 %v74_v32 }
0x170e   :  { %2024 = vmatpush3.msra.mxu0 %v74_v32 }
0x170f   :  { %2025 = vmatprep.subr.mxu0 %v73_v60 }
0x1710   :  { %2026 = vmatpush3.msra.mxu0 %v73_v60 }
0x1711   :  { %2027 = vmatprep.subr.mxu0 %v72_v55 }
0x1712   :  { %2028 = vmatpush3.msra.mxu0 %v72_v55 }
0x1713   :  { %2029 = vmatprep.subr.mxu0 %v71_v59 }
0x1714   :  { %2030 = vmatpush3.msra.mxu0 %v71_v59 }
0x1715   :  { %2031 = vmatprep.subr.mxu0 %v70_v61 }
0x1716   :  { %2032 = vmatpush3.msra.mxu0 %v70_v61 }
0x17c8   :  { %v1990_v37 = vpop.f32.mrf.mxu1 }
0x17c9   :  { %v1230_v7 = vadd.f32 %v1990_v37, %v1773_v13 }
0x17ca   :  { %v1224_v2 = vpop.f32.mrf.mxu1 }
0x17cb   :  { %2151 = vtanh.f32 %v1230_v7  ;;  %v1225_v3 = vadd.f32 %v1773_v13, %v1224_v2  ;;  %v69_v7 = vld [vmem:[#allocation5 + $0x78] sm:$0xff]  ;;  %v68_v2 = vld [vmem:[#allocation5 + $0x70] sm:$0xff] }
0x17cc   :  { %2033 = vmatprep.subr.mxu0 %v69_v7 }
0x17cd   :  { %2153 = vtanh.f32 %v1225_v3  ;;  %2034 = vmatpush3.msra.mxu0 %v69_v7  ;;  %v67_v3 = vld [vmem:[#allocation5 + $0x68] sm:$0xff] }
0x17ce   :  { %2035 = vmatprep.subr.mxu0 %v68_v2 }
0x17cf   :  { %2036 = vmatpush3.msra.mxu0 %v68_v2 }
0x17d0   :  { %2037 = vmatprep.subr.mxu0 %v67_v3 }
0x17d1   :  { %2038 = vmatpush3.msra.mxu0 %v67_v3 }
0x17d8   :  { %v2152_v5 = vpop.eup %2151 }
0x17d9   :  { %v1240_v6 = vmul.f32 %v2152_v5, %v1776_v4 }
0x17da   :  { %v2154_v8 = vpop.eup %2153 }
0x17db   :  { %v1244_v9 = vsel %vm104_vm0, %v1240_v6, 0.0  ;;  %v1239_v52 = vmul.f32 %v2154_v8, %v1776_v4  ;;  %v66_v4 = vld [vmem:[#allocation5 + $0x60] sm:$0xff] }
0x17dc   :  { %1245 = vadd.xlane.f32.xlu1 %v1244_v9  ;;  %2039 = vmatprep.subr.mxu0 %v66_v4 }
0x17dd   :  { %v1241_v10 = vsel %vm104_vm0, %v1239_v52, 0.0  ;;  %2040 = vmatpush3.msra.mxu0 %v66_v4 }
0x17de   :  { %1242 = vadd.xlane.f32.xlu0 %v1241_v10  ;;  %v1784_v10 = vld [vmem:[#allocation7 + $0x6] ss:$0 sm:$0xff] }
0x1865   :  { %v1246_v15 = vpop.xlane.xlu1 %1245 }
0x1866   :  { %v1248_v19 = vmul.f32 0.17677669, %v1246_v15 }
0x1867   :  { %v1243_v17 = vpop.xlane.xlu0 %1242 }
0x1868   :  { %v1247_v23 = vmul.f32 0.17677669, %v1243_v17 }
0x186a   :  { %v1249_v24 = vmax.f32 %v1247_v23, %v1248_v19 }
0x186c   :  { %v1250_v25 = vrot.slane %v1249_v24, 4 }
0x186e   :  { %v1251_v41 = vmax.f32 %v1249_v24, %v1250_v25  ;;  %v1785_v25 = vsel %vm1581_vm10, 1.0, %v2254_v16 }
0x1870   :  { %v1252_v26 = vrot.slane %v1251_v41, 2 }
0x1872   :  { %v1253_v27 = vmax.f32 %v1251_v41, %v1252_v26  ;;  %v93_v26 = vld [vmem:[#allocation5 + $0x138] sm:$0xff] }
0x1874   :  { %v1254_v28 = vrot.slane %v1253_v27, 1 }
0x1876   :  { %v1255_v29 = vmax.f32 %v1253_v27, %v1254_v28  ;;  %v92_v27 = vld [vmem:[#allocation5 + $0x130] sm:$0xff]  ;;  %v89_v28 = vld [vmem:[#allocation5 + $0x118] sm:$0xff] }
0x1878   :  { %v1256_v42 = vsub.f32 %v1247_v23, %v1255_v29  ;;  %v1257_v30 = vsub.f32 %v1248_v19, %v1255_v29  ;;  %v88_v29 = vld [vmem:[#allocation5 + $0x110] sm:$0xff] }
0x187a   :  { %v1260_v31 = vmul.f32 1.442695, %v1257_v30  ;;  %v1258_v33 = vmul.f32 1.442695, %v1256_v42  ;;  %v87_v42 = vld [vmem:[#allocation5 + $0x108] sm:$0xff]  ;;  %v86_v30 = vld [vmem:[#allocation5 + $0x100] sm:$0xff] }
0x187c   :  { %2155 = vpow2.f32 %v1260_v31 }
0x187d   :  { %2157 = vpow2.f32 %v1258_v33 }
0x1889   :  { %v2156_v36 = vpop.eup %2155 }
0x188a   :  { %1991 = vmatprep.subr.mxu1 %v2156_v36  ;;  %v2158_v57 = vpop.eup %2157 }
0x188b   :  { %1992 = vmatpush3.msra.mxu1 %v2156_v36 }
0x188c   :  { %1993 = vmatprep.subr.mxu1 %v2158_v57 }
0x188d   :  { %1994 = vmatpush3.msra.mxu1 %v2158_v57 }
0x188e   :  { %1996 = vmatmul.mubr.msk.f32.vlgmr.msra.gmra.mxu1 %vm1307_vm8, %v1778_v38  ;;  %1998 = vmatprep.subr.mxu1 %v65_v40 }
0x188f   :  { %1999 = vmatpush3.msra.mxu1 %v65_v40 }
0x1890   :  { %2000 = vmatprep.subr.mxu1 %v64_v18 }
0x1891   :  { %2001 = vmatpush3.msra.mxu1 %v64_v18 }
0x1892   :  { %2002 = vmatprep.subr.mxu1 %v63_v20 }
0x1893   :  { %2003 = vmatpush3.msra.mxu1 %v63_v20 }
0x1894   :  { %2004 = vmatprep.subr.mxu1 %v62_v21 }
0x1895   :  { %2005 = vmatpush3.msra.mxu1 %v62_v21 }
0x1896   :  { %2044 = vmatprep.subr.mxu1 %v2254_v16 }
0x194e   :  { %v1997_v43 = vpop.f32.mrf.mxu1 }
0x194f   :  { %2159 = vrcp.f32 %v1997_v43 }
0x1950   :  { %v1380_v44 = vpop.f32.mrf.mxu1 }
0x1951   :  { %2161 = vrcp.f32 %v1380_v44 }
0x195c   :  { %v2160_v45 = vpop.eup %2159 }
0x195d   :  { %v1392_v46 = vmul.f32 %v2160_v45, %v2156_v36 }
0x195e   :  { %v2162_v47 = vpop.eup %2161 }
0x195f   :  { %1400 = vperm.xlu1 %2082, %v1392_v46   ;;  %v1390_v22 = vmul.f32 %v2162_v47, %v2158_v57 }
0x1961   :  { %1395 = vperm.xlu0 %2081, %v1390_v22  }
0x19da   :  { %v1401_v62 = vpop.permute.xlu1 %1400 }
0x19db   :  { %v1404_v37 = vmul.f32 %v1401_v62, %v2476_v1 }
0x19dc   :  { %v1396_v63 = vpop.permute.xlu0 %1395 }
0x19dd   :  { %v1403_v13 = vmul.f32 %v1396_v63, %v2474_v0  ;;  %v1781_v0 = vld [vmem:[#allocation7 + $0x5] ss:$0 sm:$0xff] }
0x19df   :  { %2006 = vmatprep.mubr.msk.f32.mxu1 %vm104_vm0, %v1403_v13 }
0x19e0   :  { %2007 = vmatmul.mubr.msk.f32.vlgmr.msra.gmra.mxu1 %vm104_vm0, %v1404_v37 }
0x19e1   :  { %2048 = vmatprep.mubr.msk.f32.mxu1 %vm2255_vm1, %v2254_v16 }
0x1aa0   :  { %v2008_v1 = vpop.f32.mrf.mxu1 }
0x1aa1   :  { %v1487_v5 = vadd.f32 %v2008_v1, %v1781_v0 }
0x1aa2   :  { %v1481_v6 = vpop.f32.mrf.mxu1 }
0x1aa3   :  { %v1482_v8 = vadd.f32 %v1781_v0, %v1481_v6  ;;  %v1491_v52 = vmax.f32 %v1487_v5, 0.0 }
0x1aa5   :  { %v1490_v9 = vmax.f32 %v1482_v8, 0.0 }
0x1aa7   :  { %2041 = vmatprep.mubr.f32.mxu0 %v1490_v9 }
0x1aa8   :  { %2042 = vmatmul.mubr.f32.vlgmr.msra.gmra.mxu0 %v1491_v52 }
0x1b68   :  { %v2043_v11 = vpop.f32.mrf.mxu0 }
0x1b69   :  { %v1568_v14 = vadd.f32 %v2043_v11, %v1784_v10 }
0x1b6a   :  { %v1562_v15 = vpop.f32.mrf.mxu0 }
0x1b6b   :  { %1575 = vrot.lane.b32.xlu1 %v1568_v14, %s2256_s0  ;;  %v1563_v17 = vadd.f32 %v1784_v10, %v1562_v15 }
0x1b6f   :  { %1573 = vrot.lane.b32.xlu1 %v1563_v17, %s2256_s0 }
0x1bdd   :  { %v1576_v19 = vpop.permute.xlu1 %1575 }
0x1bde   :  { %v1580_v23 = vsel %vm104_vm0, %v1404_v37, %v1576_v19 }
0x1bdf   :  { %2045 = vmatpush3.msra.mxu1 %v1580_v23 }
0x1be0   :  { %2046 = vmatprep.subr.mxu1 %v2254_v16 }
0x1be1   :  { %v1574_v24 = vpop.permute.xlu1 %1573 }
0x1be2   :  { %v1579_v41 = vsel %vm104_vm0, %v1403_v13, %v1574_v24 }
0x1be3   :  { %2047 = vmatpush3.msra.mxu1 %v1579_v41 }
0x1be4   :  { %2049 = vmatmul.mubr.msk.f32.vlgmr.msra.gmra.mxu1 %vm1307_vm8, %v1785_v25  ;;  %2051 = vmatprep.subr.mxu1 %v2254_v16 }
0x1be5   :  { %2052 = vmatpush3.msra.mxu1 %v93_v26  ;;  %2067 = vmatprep.mubr.msk.f32.mxu1 %vm2255_vm1, %v2254_v16 }
0x1be6   :  { %2053 = vmatprep.subr.mxu1 %v2254_v16 }
0x1be7   :  { %2054 = vmatpush3.msra.mxu1 %v92_v27 }
0x1be8   :  { %2055 = vmatprep.subr.mxu1 %v2254_v16 }
0x1be9   :  { %2056 = vmatpush3.msra.mxu1 %v91_v56 }
0x1bea   :  { %2057 = vmatprep.subr.mxu1 %v2254_v16 }
0x1beb   :  { %2058 = vmatpush3.msra.mxu1 %v90_v12 }
0x1bec   :  { %2059 = vmatprep.subr.mxu1 %v2254_v16 }
0x1bed   :  { %2060 = vmatpush3.msra.mxu1 %v89_v28 }
0x1bee   :  { %2061 = vmatprep.subr.mxu1 %v2254_v16 }
0x1bef   :  { %2062 = vmatpush3.msra.mxu1 %v88_v29 }
0x1bf0   :  { %2063 = vmatprep.subr.mxu1 %v2254_v16 }
0x1bf1   :  { %2064 = vmatpush3.msra.mxu1 %v87_v42 }
0x1bf2   :  { %2065 = vmatprep.subr.mxu1 %v2254_v16 }
0x1bf3   :  { %2066 = vmatpush3.msra.mxu1 %v86_v30 }
0x1ca4   :  { %v1653_v31 = vpop.f32.mrf.mxu1 }
0x1ca5   :  { %2068 = vmatmul.mubr.msk.f32.vlgmr.msra.gmra.mxu1 %vm1661_vm11, %v1653_v31 }
0x1ca6   :  { %v2050_v33 = vpop.f32.mrf.mxu1 }
0x1d65   :  { %v1731_v35 = vpop.f32.mrf.mxu1 }
0x1d66   :  { %v1732_v36 = vadd.f32 %v1787_v34, %v1731_v35 }
0x1d67   :  { %v2069_v57 = vpop.f32.mrf.mxu1 }
0x1d68   :  { %1736 = vst.msk [vmem:[#allocation8] sm:$0x3] %vm1735_vm12, %v1732_v36 }
0x1d69   :  { %2234 = shalt.err (!%p2231_p5)
}
0x1d6a   :  { %1746 = dma.vmem_to_hbm [thread:$0]  %s1744_s29, 32, %s2530_s3, [#allocation4]  }
0x1d6b   :  { %2247 = dma.done.wait [#allocation4], 32  }
0x1d6c   :  { %2248 = vsyncadd [#allocation4], 4294967264 }
0x1d6d   :  { %1750 = vsyncpa [#allocation3], 1 }
0x1d6e   :  { %1751 = vsyncpa [#allocation6], 1 }
0x1d6f   :  { %1752 = vsyncpa [#allocation4], 1 }

</bundles_post_ra>
